<compile_context>
chip_gen: v5e
topology: v5e:2x2
jax: 0.10.0
libtpu: 0.0.40
codegen_flags: <defaults>
</compile_context>

<pallas_src>
import math

import jax
import jax.numpy as jnp
from jax import lax
from jax.experimental import pallas as pl
from jax.experimental.pallas import tpu as pltpu


def _round_up(x, m):
    return (x + m - 1) // m * m


def _gru_seq_kernel(x_ref, wih_ref, whh_ref, bgi_ref, bhn_ref, out_ref,
                    gi_sc, h_sc):
    """One grid step = Tc timesteps of the GRU recurrence for one M-block.

    x_ref  : [Tc, Mb, H]   bf16  input block (time-major)
    wih_ref: [H, 3Hp]      f32   input-projection weights (transposed, gate-padded)
    whh_ref: [3, Hp, Hp]   f32   recurrent weights, one [Hp, Hp] slab per gate
    bgi_ref: [1, 3Hp]      f32   b_ih (+ b_hr, b_hz) folded input-side bias
    bhn_ref: [1, Hp]       f32   b_hn (must stay inside r * (...))
    out_ref: [Tc, Mb, Hp]  f32   hidden states for these timesteps
    gi_sc  : [Tc*Mb, 3Hp]  f32   scratch for the hoisted input projections
    h_sc   : [Mb, Hp]      f32   persistent hidden state across time blocks
    """
    # New M-block => reset the hidden state.
    @pl.when(pl.program_id(1) == 0)
    def _():
        h_sc[...] = jnp.zeros_like(h_sc)

    Tc, Mb, Hin = x_ref.shape
    Hp = h_sc.shape[-1]

    # Hoisted, time-parallel input projection: one GEMM per grid step, off the
    # serial h-dependence chain.  Folded biases added here (f32 operands only).
    x2d = x_ref[...].astype(jnp.float32).reshape(Tc * Mb, Hin)
    gi_sc[...] = (jnp.dot(x2d, wih_ref[...],
                          preferred_element_type=jnp.float32)
                  + bgi_ref[...])

    whh_r = whh_ref[0]        # [Hp, Hp], resident for the whole grid step
    whh_z = whh_ref[1]
    whh_n = whh_ref[2]
    b_hn = bhn_ref[...]       # [1, Hp]

    def step(i, h):
        gi = gi_sc[pl.ds(i * Mb, Mb), :]       # [Mb, 3Hp]; 128-aligned gate cols
        # Per-gate recurrent matmuls keep MXU-result live ranges small and let
        # the EUP start on r while the z / n matmuls are still draining.
        r = jax.nn.sigmoid(
            gi[:, 0:Hp]
            + jnp.dot(h, whh_r, preferred_element_type=jnp.float32))
        z = jax.nn.sigmoid(
            gi[:, Hp:2 * Hp]
            + jnp.dot(h, whh_z, preferred_element_type=jnp.float32))
        gh_n = jnp.dot(h, whh_n, preferred_element_type=jnp.float32)
        n = jnp.tanh(gi[:, 2 * Hp:3 * Hp] + r * (gh_n + b_hn))
        h_new = (1.0 - z) * n + z * h          # carry / blend stay in f32
        out_ref[i] = h_new.astype(out_ref.dtype)
        return h_new

    h_final = lax.fori_loop(0, Tc, step, h_sc[...], unroll=min(8, Tc))
    h_sc[...] = h_final


def _vmem_bytes(Tc, Mb, Hin, Hp):
    x_blk = 2 * Tc * Mb * Hin * 2            # bf16 input, double-buffered
    out_blk = 2 * Tc * Mb * Hp * 4           # f32 output, double-buffered
    gi_sc = Tc * Mb * 3 * Hp * 4             # hoisted projection scratch
    h_sc = Mb * Hp * 4
    weights = 2 * (Hin * 3 * Hp + 3 * Hp * Hp + 4 * Hp) * 4
    return x_blk + out_blk + gi_sc + h_sc + weights


def rnn_layer_forward(X, params, *, tc_max=32, mb_max=256,
                      vmem_budget=40 << 20):
    """X: [batch, seq_len, num_nodes, hidden_dim] float32.
       Returns [seq_len, batch*num_nodes, hidden_dim] (matches torch.stack)."""
    B, S, N, H = X.shape
    M = B * N
    Hp = _round_up(H, 128)                   # lane-dense gate / hidden width

    # Row blocking: >= 2 blocks when there is enough work so the "parallel"
    # grid axis can shard across v7x's two TensorCores; Mb is the multiple of
    # 8 closest to M / n_blk (minimizes dead-row padding).
    n_blk = max(2, pl.cdiv(M, mb_max)) if M >= 16 else 1
    Mb = _round_up(pl.cdiv(M, n_blk), 8)
    Mp = Mb * n_blk

    # Time blocking: large Tc amortizes per-grid-step pipeline overhead;
    # shrink until the VMEM working set fits the (v7x-safe) budget.
    Tc = max(1, min(tc_max, S))
    while Tc > 1 and _vmem_bytes(Tc, Mb, H, Hp) > vmem_budget:
        Tc = max(1, Tc // 2)
    Sp = _round_up(S, Tc)

    w_ih, w_hh = params["w_ih"], params["w_hh"]
    b_ih, b_hh = params["b_ih"], params["b_hh"]

    # Gate-padded transposed weights: gate g occupies columns [g*Hp, g*Hp+H).
    # Zero rows/cols beyond H keep padded hidden lanes from contaminating
    # real gate outputs (padded h lanes stay at 0).
    wt_i = jnp.transpose(w_ih).astype(jnp.float32)      # [H, 3H]
    wt_h = jnp.transpose(w_hh).astype(jnp.float32)      # [H, 3H]
    wih_t = jnp.zeros((H, 3 * Hp), jnp.float32)
    whh3 = jnp.zeros((3, Hp, Hp), jnp.float32)
    for g in range(3):
        wih_t = wih_t.at[:, g * Hp:g * Hp + H].set(wt_i[:, g * H:(g + 1) * H])
        whh3 = whh3.at[g, 0:H, 0:H].set(wt_h[:, g * H:(g + 1) * H])

    # Fold b_ih (all gates) plus b_hr, b_hz into the hoisted projection bias;
    # b_hn must stay inside r * (gh_n + b_hn).
    b_gi = jnp.zeros((1, 3 * Hp), jnp.float32)
    b_gi = b_gi.at[0, 0 * Hp:0 * Hp + H].set(b_ih[0:H] + b_hh[0:H])          # r
    b_gi = b_gi.at[0, 1 * Hp:1 * Hp + H].set(b_ih[H:2 * H] + b_hh[H:2 * H])  # z
    b_gi = b_gi.at[0, 2 * Hp:2 * Hp + H].set(b_ih[2 * H:3 * H])              # n
    b_hn = jnp.zeros((1, Hp), jnp.float32).at[0, 0:H].set(b_hh[2 * H:3 * H])

    # (B,S,N,H) -> (S, B*N, H) time-major layout, stored bf16 (halves the HBM
    # stream the kernel reads).  No 3Hp-wide f32 gi is ever materialized.
    xs = jnp.transpose(X, (1, 0, 2, 3)).reshape(S, M, H).astype(jnp.bfloat16)
    xs = jnp.pad(xs, ((0, Sp - S), (0, Mp - M), (0, 0)))

    vmem_limit = int(max(32 << 20,
                         min(_vmem_bytes(Tc, Mb, H, Hp) + (4 << 20),
                             100 << 20)))

    out = pl.pallas_call(
        _gru_seq_kernel,
        out_shape=jax.ShapeDtypeStruct((Sp, Mp, Hp), jnp.float32),
        grid_spec=pltpu.PrefetchScalarGridSpec(
            num_scalar_prefetch=0,
            grid=(Mp // Mb, Sp // Tc),
            in_specs=[
                pl.BlockSpec((Tc, Mb, H), lambda m, t: (t, m, 0)),       # X
                pl.BlockSpec((H, 3 * Hp), lambda m, t: (0, 0)),          # W_ih^T
                pl.BlockSpec((3, Hp, Hp), lambda m, t: (0, 0, 0)),       # W_hh^T
                pl.BlockSpec((1, 3 * Hp), lambda m, t: (0, 0)),          # b_gi
                pl.BlockSpec((1, Hp), lambda m, t: (0, 0)),              # b_hn
            ],
            out_specs=pl.BlockSpec((Tc, Mb, Hp), lambda m, t: (t, m, 0)),
            scratch_shapes=[
                pltpu.VMEM((Tc * Mb, 3 * Hp), jnp.float32),   # hoisted gi
                pltpu.VMEM((Mb, Hp), jnp.float32),            # hidden carry
            ],
        ),
        compiler_params=pltpu.CompilerParams(
            # M-blocks independent (megacore-shardable); time chain is serial.
            dimension_semantics=("parallel", "arbitrary"),
            vmem_limit_bytes=vmem_limit,
        ),
    )(xs, wih_t, whh3, b_gi, b_hn)

    # Dropout (eval semantics) -> identity; strip lane / row / time padding.
    return out[:S, :M, :H]


def init_params(hidden_dim, key):
    # nn.GRUCell default init: U(-1/sqrt(hidden), 1/sqrt(hidden))
    k = 1.0 / math.sqrt(hidden_dim)
    k1, k2, k3, k4 = jax.random.split(key, 4)
    return {
        "w_ih": jax.random.uniform(k1, (3 * hidden_dim, hidden_dim), jnp.float32, -k, k),
        "w_hh": jax.random.uniform(k2, (3 * hidden_dim, hidden_dim), jnp.float32, -k, k),
        "b_ih": jax.random.uniform(k3, (3 * hidden_dim,), jnp.float32, -k, k),
        "b_hh": jax.random.uniform(k4, (3 * hidden_dim,), jnp.float32, -k, k),
    }


def _reference(X, params):
    """Pure-JAX reference. Matches the kernel's numerics: X stored as bf16
    (rounded), all matmuls / gate math in f32."""
    B, S, N, H = X.shape
    x = jnp.transpose(X, (0, 2, 1, 3)).reshape(B * N, S, H)
    x = x.astype(jnp.bfloat16).astype(jnp.float32)
    wih, whh = params["w_ih"], params["w_hh"]
    b_ih, b_hh = params["b_ih"], params["b_hh"]
    h = jnp.zeros((B * N, H), jnp.float32)
    outs = []
    for t in range(S):
        gi = x[:, t, :] @ wih.T + b_ih
        gh = h @ whh.T + b_hh
        i_r, i_z, i_n = jnp.split(gi, 3, axis=-1)
        h_r, h_z, h_n = jnp.split(gh, 3, axis=-1)
        r = jax.nn.sigmoid(i_r + h_r)
        z = jax.nn.sigmoid(i_z + h_z)
        n = jnp.tanh(i_n + r * h_n)
        h = (1.0 - z) * n + z * h
        outs.append(h)
    return jnp.stack(outs, axis=0)


if __name__ == "__main__":
    batch, seq_len, num_nodes, hidden_dim = 2, 8, 4, 32
    key = jax.random.PRNGKey(0)
    kx, kp = jax.random.split(key)
    X = jax.random.normal(kx, (batch, seq_len, num_nodes, hidden_dim), jnp.float32)
    params = init_params(hidden_dim, kp)

    out = jax.block_until_ready(rnn_layer_forward(X, params))
    ref = jax.block_until_ready(_reference(X, params))

    assert out.shape == (seq_len, batch * num_nodes, hidden_dim), out.shape
    err = float(jnp.max(jnp.abs(out - ref)))
    assert jnp.allclose(out, ref, atol=2e-3, rtol=2e-3), err

    print("KERNEL_OK")
</pallas_src>

<mosaic_0001>
module attributes {stable_mosaic.version = 11 : i64} {
  func.func @_gru_seq_kernel(%arg0: i32, %arg1: i32, %arg2: memref<8x8x32xbf16, #tpu.memory_space<vmem>>, %arg3: memref<32x384xf32, #tpu.memory_space<vmem>>, %arg4: memref<3x128x128xf32, #tpu.memory_space<vmem>>, %arg5: memref<1x384xf32, #tpu.memory_space<vmem>>, %arg6: memref<1x128xf32, #tpu.memory_space<vmem>>, %arg7: memref<8x8x128xf32, #tpu.memory_space<vmem>>, %arg8: memref<64x384xf32, #tpu.memory_space<vmem>>, %arg9: memref<8x128xf32, #tpu.memory_space<vmem>>) attributes {dimension_semantics = [#tpu.dimension_semantics<parallel>, #tpu.dimension_semantics<arbitrary>], iteration_bounds = array<i64: 1, 1>, scalar_prefetch = 0 : i64, scratch_operands = 2 : i64, tpu.core_type = #tpu.core_type<tc>, window_params = [{transform_indices = @transform_0, window_bounds = array<i64: 8, 8, 32>}, {pipeline_mode = #tpu.pipeline_mode<synchronous>, transform_indices = @transform_1, window_bounds = array<i64: 32, 384>}, {pipeline_mode = #tpu.pipeline_mode<synchronous>, transform_indices = @transform_2, window_bounds = array<i64: 3, 128, 128>}, {pipeline_mode = #tpu.pipeline_mode<synchronous>, transform_indices = @transform_3, window_bounds = array<i64: 1, 384>}, {pipeline_mode = #tpu.pipeline_mode<synchronous>, transform_indices = @transform_4, window_bounds = array<i64: 1, 128>}, {transform_indices = @transform_5, window_bounds = array<i64: 8, 8, 128>}]} {
    %c0_i32 = arith.constant 0 : i32
    %0 = arith.cmpi eq, %arg1, %c0_i32 : i32
    %1 = arith.extui %0 : i1 to i32
    %c0_i32_0 = arith.constant 0 : i32
    %2 = arith.cmpi ne, %1, %c0_i32_0 : i32
    scf.if %2 {
      %cst_103 = arith.constant 0.000000e+00 : f32
      %301 = vector.broadcast %cst_103 : f32 to vector<8x128xf32>
      %c0_104 = arith.constant 0 : index
      %c0_105 = arith.constant 0 : index
      %302 = vector.load %arg9[%c0_104, %c0_105] : memref<8x128xf32, #tpu.memory_space<vmem>>, vector<8x128xf32>
      tpu.vector_store %arg9[%c0_104, %c0_105], %301 {strides = array<i32>} : memref<8x128xf32, #tpu.memory_space<vmem>>, vector<8x128xf32>,
    } else {
    }
    %c0 = arith.constant 0 : index
    %c0_1 = arith.constant 0 : index
    %c0_2 = arith.constant 0 : index
    %3 = vector.load %arg2[%c0, %c0_1, %c0_2] : memref<8x8x32xbf16, #tpu.memory_space<vmem>>, vector<8x8x32xbf16>
    %4 = arith.extf %3 : vector<8x8x32xbf16> to vector<8x8x32xf32>
    %5 = vector.shape_cast %4 : vector<8x8x32xf32> to vector<64x32xf32>
    %c0_3 = arith.constant 0 : index
    %c0_4 = arith.constant 0 : index
    %6 = vector.load %arg3[%c0_3, %c0_4] : memref<32x384xf32, #tpu.memory_space<vmem>>, vector<32x384xf32>
    %cst = arith.constant dense<0.000000e+00> : vector<64x384xf32>
    %7 = tpu.matmul %5, %6, %cst {dimension_numbers = #tpu.dot_dimension_numbers<[1], [0], [0], [1], [0, 0, 1, 1], [], []>} : vector<64x32xf32>, vector<32x384xf32>, vector<64x384xf32> -> vector<64x384xf32>
    %c0_5 = arith.constant 0 : index
    %c0_6 = arith.constant 0 : index
    %8 = vector.load %arg5[%c0_5, %c0_6] : memref<1x384xf32, #tpu.memory_space<vmem>>, vector<1x384xf32>
    %9 = vector.broadcast %8 : vector<1x384xf32> to vector<64x384xf32>
    %10 = arith.addf %7, %9 : vector<64x384xf32>
    %c0_7 = arith.constant 0 : index
    %c0_8 = arith.constant 0 : index
    %11 = vector.load %arg8[%c0_7, %c0_8] : memref<64x384xf32, #tpu.memory_space<vmem>>, vector<64x384xf32>
    tpu.vector_store %arg8[%c0_7, %c0_8], %10 {strides = array<i32>} : memref<64x384xf32, #tpu.memory_space<vmem>>, vector<64x384xf32>,
    %c0_9 = arith.constant 0 : index
    %c0_10 = arith.constant 0 : index
    %c0_11 = arith.constant 0 : index
    %12 = vector.load %arg4[%c0_9, %c0_10, %c0_11] : memref<3x128x128xf32, #tpu.memory_space<vmem>>, vector<1x128x128xf32>
    %13 = vector.shape_cast %12 : vector<1x128x128xf32> to vector<128x128xf32>
    %c1 = arith.constant 1 : index
    %c0_12 = arith.constant 0 : index
    %c0_13 = arith.constant 0 : index
    %14 = vector.load %arg4[%c1, %c0_12, %c0_13] : memref<3x128x128xf32, #tpu.memory_space<vmem>>, vector<1x128x128xf32>
    %15 = vector.shape_cast %14 : vector<1x128x128xf32> to vector<128x128xf32>
    %c2 = arith.constant 2 : index
    %c0_14 = arith.constant 0 : index
    %c0_15 = arith.constant 0 : index
    %16 = vector.load %arg4[%c2, %c0_14, %c0_15] : memref<3x128x128xf32, #tpu.memory_space<vmem>>, vector<1x128x128xf32>
    %17 = vector.shape_cast %16 : vector<1x128x128xf32> to vector<128x128xf32>
    %c0_16 = arith.constant 0 : index
    %c0_17 = arith.constant 0 : index
    %18 = vector.load %arg6[%c0_16, %c0_17] : memref<1x128xf32, #tpu.memory_space<vmem>>, vector<1x128xf32>
    %c0_18 = arith.constant 0 : index
    %c0_19 = arith.constant 0 : index
    %19 = vector.load %arg9[%c0_18, %c0_19] : memref<8x128xf32, #tpu.memory_space<vmem>>, vector<8x128xf32>
    %c0_i32_20 = arith.constant 0 : i32
    %c8_i32 = arith.constant 8 : i32
    %20 = arith.muli %c0_i32_20, %c8_i32 : i32
    %21 = arith.index_cast %20 : i32 to index
    %c0_21 = arith.constant 0 : index
    %22 = vector.load %arg8[%21, %c0_21] : memref<64x384xf32, #tpu.memory_space<vmem>>, vector<8x384xf32>
    %23 = vector.extract_strided_slice %22 {offsets = [0, 0], sizes = [8, 128], strides = [1, 1]} : vector<8x384xf32> to vector<8x128xf32>
    %cst_22 = arith.constant dense<0.000000e+00> : vector<8x128xf32>
    %24 = tpu.matmul %19, %13, %cst_22 {dimension_numbers = #tpu.dot_dimension_numbers<[1], [0], [0], [1], [0, 0, 1, 1], [], []>} : vector<8x128xf32>, vector<128x128xf32>, vector<8x128xf32> -> vector<8x128xf32>
    %25 = arith.addf %23, %24 : vector<8x128xf32>
    %26 = arith.negf %25 : vector<8x128xf32>
    %27 = math.exp %26 : vector<8x128xf32>
    %cst_23 = arith.constant 1.000000e+00 : f32
    %28 = vector.broadcast %cst_23 : f32 to vector<8x128xf32>
    %29 = arith.addf %28, %27 : vector<8x128xf32>
    %30 = arith.divf %28, %29 : vector<8x128xf32>
    %31 = vector.extract_strided_slice %22 {offsets = [0, 128], sizes = [8, 128], strides = [1, 1]} : vector<8x384xf32> to vector<8x128xf32>
    %cst_24 = arith.constant dense<0.000000e+00> : vector<8x128xf32>
    %32 = tpu.matmul %19, %15, %cst_24 {dimension_numbers = #tpu.dot_dimension_numbers<[1], [0], [0], [1], [0, 0, 1, 1], [], []>} : vector<8x128xf32>, vector<128x128xf32>, vector<8x128xf32> -> vector<8x128xf32>
    %33 = arith.addf %31, %32 : vector<8x128xf32>
    %34 = arith.negf %33 : vector<8x128xf32>
    %35 = math.exp %34 : vector<8x128xf32>
    %cst_25 = arith.constant 1.000000e+00 : f32
    %36 = vector.broadcast %cst_25 : f32 to vector<8x128xf32>
    %37 = arith.addf %36, %35 : vector<8x128xf32>
    %38 = arith.divf %36, %37 : vector<8x128xf32>
    %cst_26 = arith.constant dense<0.000000e+00> : vector<8x128xf32>
    %39 = tpu.matmul %19, %17, %cst_26 {dimension_numbers = #tpu.dot_dimension_numbers<[1], [0], [0], [1], [0, 0, 1, 1], [], []>} : vector<8x128xf32>, vector<128x128xf32>, vector<8x128xf32> -> vector<8x128xf32>
    %40 = vector.extract_strided_slice %22 {offsets = [0, 256], sizes = [8, 128], strides = [1, 1]} : vector<8x384xf32> to vector<8x128xf32>
    %41 = vector.broadcast %18 : vector<1x128xf32> to vector<8x128xf32>
    %42 = arith.addf %39, %41 : vector<8x128xf32>
    %43 = arith.mulf %30, %42 : vector<8x128xf32>
    %44 = arith.addf %40, %43 : vector<8x128xf32>
    %45 = math.tanh %44 : vector<8x128xf32>
    %cst_27 = arith.constant 1.000000e+00 : f32
    %46 = vector.broadcast %cst_27 : f32 to vector<8x128xf32>
    %47 = arith.subf %46, %38 : vector<8x128xf32>
    %48 = arith.mulf %47, %45 : vector<8x128xf32>
    %49 = arith.mulf %38, %19 : vector<8x128xf32>
    %50 = arith.addf %48, %49 : vector<8x128xf32>
    %51 = arith.index_cast %c0_i32_20 : i32 to index
    %c0_28 = arith.constant 0 : index
    %c0_29 = arith.constant 0 : index
    %52 = vector.load %arg7[%51, %c0_28, %c0_29] : memref<8x8x128xf32, #tpu.memory_space<vmem>>, vector<1x8x128xf32>
    %53 = vector.shape_cast %52 : vector<1x8x128xf32> to vector<8x128xf32>
    %54 = vector.shape_cast %50 : vector<8x128xf32> to vector<1x8x128xf32>
    tpu.vector_store %arg7[%51, %c0_28, %c0_29], %54 {strides = array<i32>} : memref<8x8x128xf32, #tpu.memory_space<vmem>>, vector<1x8x128xf32>,
    %c1_i32 = arith.constant 1 : i32
    %c8_i32_30 = arith.constant 8 : i32
    %55 = arith.muli %c1_i32, %c8_i32_30 : i32
    %56 = arith.index_cast %55 : i32 to index
    %c0_31 = arith.constant 0 : index
    %57 = vector.load %arg8[%56, %c0_31] : memref<64x384xf32, #tpu.memory_space<vmem>>, vector<8x384xf32>
    %58 = vector.extract_strided_slice %57 {offsets = [0, 0], sizes = [8, 128], strides = [1, 1]} : vector<8x384xf32> to vector<8x128xf32>
    %cst_32 = arith.constant dense<0.000000e+00> : vector<8x128xf32>
    %59 = tpu.matmul %50, %13, %cst_32 {dimension_numbers = #tpu.dot_dimension_numbers<[1], [0], [0], [1], [0, 0, 1, 1], [], []>} : vector<8x128xf32>, vector<128x128xf32>, vector<8x128xf32> -> vector<8x128xf32>
    %60 = arith.addf %58, %59 : vector<8x128xf32>
    %61 = arith.negf %60 : vector<8x128xf32>
    %62 = math.exp %61 : vector<8x128xf32>
    %cst_33 = arith.constant 1.000000e+00 : f32
    %63 = vector.broadcast %cst_33 : f32 to vector<8x128xf32>
    %64 = arith.addf %63, %62 : vector<8x128xf32>
    %65 = arith.divf %63, %64 : vector<8x128xf32>
    %66 = vector.extract_strided_slice %57 {offsets = [0, 128], sizes = [8, 128], strides = [1, 1]} : vector<8x384xf32> to vector<8x128xf32>
    %cst_34 = arith.constant dense<0.000000e+00> : vector<8x128xf32>
    %67 = tpu.matmul %50, %15, %cst_34 {dimension_numbers = #tpu.dot_dimension_numbers<[1], [0], [0], [1], [0, 0, 1, 1], [], []>} : vector<8x128xf32>, vector<128x128xf32>, vector<8x128xf32> -> vector<8x128xf32>
    %68 = arith.addf %66, %67 : vector<8x128xf32>
    %69 = arith.negf %68 : vector<8x128xf32>
    %70 = math.exp %69 : vector<8x128xf32>
    %cst_35 = arith.constant 1.000000e+00 : f32
    %71 = vector.broadcast %cst_35 : f32 to vector<8x128xf32>
    %72 = arith.addf %71, %70 : vector<8x128xf32>
    %73 = arith.divf %71, %72 : vector<8x128xf32>
    %cst_36 = arith.constant dense<0.000000e+00> : vector<8x128xf32>
    %74 = tpu.matmul %50, %17, %cst_36 {dimension_numbers = #tpu.dot_dimension_numbers<[1], [0], [0], [1], [0, 0, 1, 1], [], []>} : vector<8x128xf32>, vector<128x128xf32>, vector<8x128xf32> -> vector<8x128xf32>
    %75 = vector.extract_strided_slice %57 {offsets = [0, 256], sizes = [8, 128], strides = [1, 1]} : vector<8x384xf32> to vector<8x128xf32>
    %76 = vector.broadcast %18 : vector<1x128xf32> to vector<8x128xf32>
    %77 = arith.addf %74, %76 : vector<8x128xf32>
    %78 = arith.mulf %65, %77 : vector<8x128xf32>
    %79 = arith.addf %75, %78 : vector<8x128xf32>
    %80 = math.tanh %79 : vector<8x128xf32>
    %cst_37 = arith.constant 1.000000e+00 : f32
    %81 = vector.broadcast %cst_37 : f32 to vector<8x128xf32>
    %82 = arith.subf %81, %73 : vector<8x128xf32>
    %83 = arith.mulf %82, %80 : vector<8x128xf32>
    %84 = arith.mulf %73, %50 : vector<8x128xf32>
    %85 = arith.addf %83, %84 : vector<8x128xf32>
    %86 = arith.index_cast %c1_i32 : i32 to index
    %c0_38 = arith.constant 0 : index
    %c0_39 = arith.constant 0 : index
    %87 = vector.load %arg7[%86, %c0_38, %c0_39] : memref<8x8x128xf32, #tpu.memory_space<vmem>>, vector<1x8x128xf32>
    %88 = vector.shape_cast %87 : vector<1x8x128xf32> to vector<8x128xf32>
    %89 = vector.shape_cast %85 : vector<8x128xf32> to vector<1x8x128xf32>
    tpu.vector_store %arg7[%86, %c0_38, %c0_39], %89 {strides = array<i32>} : memref<8x8x128xf32, #tpu.memory_space<vmem>>, vector<1x8x128xf32>,
    %c2_i32 = arith.constant 2 : i32
    %c8_i32_40 = arith.constant 8 : i32
    %90 = arith.muli %c2_i32, %c8_i32_40 : i32
    %91 = arith.index_cast %90 : i32 to index
    %c0_41 = arith.constant 0 : index
    %92 = vector.load %arg8[%91, %c0_41] : memref<64x384xf32, #tpu.memory_space<vmem>>, vector<8x384xf32>
    %93 = vector.extract_strided_slice %92 {offsets = [0, 0], sizes = [8, 128], strides = [1, 1]} : vector<8x384xf32> to vector<8x128xf32>
    %cst_42 = arith.constant dense<0.000000e+00> : vector<8x128xf32>
    %94 = tpu.matmul %85, %13, %cst_42 {dimension_numbers = #tpu.dot_dimension_numbers<[1], [0], [0], [1], [0, 0, 1, 1], [], []>} : vector<8x128xf32>, vector<128x128xf32>, vector<8x128xf32> -> vector<8x128xf32>
    %95 = arith.addf %93, %94 : vector<8x128xf32>
    %96 = arith.negf %95 : vector<8x128xf32>
    %97 = math.exp %96 : vector<8x128xf32>
    %cst_43 = arith.constant 1.000000e+00 : f32
    %98 = vector.broadcast %cst_43 : f32 to vector<8x128xf32>
    %99 = arith.addf %98, %97 : vector<8x128xf32>
    %100 = arith.divf %98, %99 : vector<8x128xf32>
    %101 = vector.extract_strided_slice %92 {offsets = [0, 128], sizes = [8, 128], strides = [1, 1]} : vector<8x384xf32> to vector<8x128xf32>
    %cst_44 = arith.constant dense<0.000000e+00> : vector<8x128xf32>
    %102 = tpu.matmul %85, %15, %cst_44 {dimension_numbers = #tpu.dot_dimension_numbers<[1], [0], [0], [1], [0, 0, 1, 1], [], []>} : vector<8x128xf32>, vector<128x128xf32>, vector<8x128xf32> -> vector<8x128xf32>
    %103 = arith.addf %101, %102 : vector<8x128xf32>
    %104 = arith.negf %103 : vector<8x128xf32>
    %105 = math.exp %104 : vector<8x128xf32>
    %cst_45 = arith.constant 1.000000e+00 : f32
    %106 = vector.broadcast %cst_45 : f32 to vector<8x128xf32>
    %107 = arith.addf %106, %105 : vector<8x128xf32>
    %108 = arith.divf %106, %107 : vector<8x128xf32>
    %cst_46 = arith.constant dense<0.000000e+00> : vector<8x128xf32>
    %109 = tpu.matmul %85, %17, %cst_46 {dimension_numbers = #tpu.dot_dimension_numbers<[1], [0], [0], [1], [0, 0, 1, 1], [], []>} : vector<8x128xf32>, vector<128x128xf32>, vector<8x128xf32> -> vector<8x128xf32>
    %110 = vector.extract_strided_slice %92 {offsets = [0, 256], sizes = [8, 128], strides = [1, 1]} : vector<8x384xf32> to vector<8x128xf32>
    %111 = vector.broadcast %18 : vector<1x128xf32> to vector<8x128xf32>
    %112 = arith.addf %109, %111 : vector<8x128xf32>
    %113 = arith.mulf %100, %112 : vector<8x128xf32>
    %114 = arith.addf %110, %113 : vector<8x128xf32>
    %115 = math.tanh %114 : vector<8x128xf32>
    %cst_47 = arith.constant 1.000000e+00 : f32
    %116 = vector.broadcast %cst_47 : f32 to vector<8x128xf32>
    %117 = arith.subf %116, %108 : vector<8x128xf32>
    %118 = arith.mulf %117, %115 : vector<8x128xf32>
    %119 = arith.mulf %108, %85 : vector<8x128xf32>
    %120 = arith.addf %118, %119 : vector<8x128xf32>
    %121 = arith.index_cast %c2_i32 : i32 to index
    %c0_48 = arith.constant 0 : index
    %c0_49 = arith.constant 0 : index
    %122 = vector.load %arg7[%121, %c0_48, %c0_49] : memref<8x8x128xf32, #tpu.memory_space<vmem>>, vector<1x8x128xf32>
    %123 = vector.shape_cast %122 : vector<1x8x128xf32> to vector<8x128xf32>
    %124 = vector.shape_cast %120 : vector<8x128xf32> to vector<1x8x128xf32>
    tpu.vector_store %arg7[%121, %c0_48, %c0_49], %124 {strides = array<i32>} : memref<8x8x128xf32, #tpu.memory_space<vmem>>, vector<1x8x128xf32>,
    %c3_i32 = arith.constant 3 : i32
    %c8_i32_50 = arith.constant 8 : i32
    %125 = arith.muli %c3_i32, %c8_i32_50 : i32
    %126 = arith.index_cast %125 : i32 to index
    %c0_51 = arith.constant 0 : index
    %127 = vector.load %arg8[%126, %c0_51] : memref<64x384xf32, #tpu.memory_space<vmem>>, vector<8x384xf32>
    %128 = vector.extract_strided_slice %127 {offsets = [0, 0], sizes = [8, 128], strides = [1, 1]} : vector<8x384xf32> to vector<8x128xf32>
    %cst_52 = arith.constant dense<0.000000e+00> : vector<8x128xf32>
    %129 = tpu.matmul %120, %13, %cst_52 {dimension_numbers = #tpu.dot_dimension_numbers<[1], [0], [0], [1], [0, 0, 1, 1], [], []>} : vector<8x128xf32>, vector<128x128xf32>, vector<8x128xf32> -> vector<8x128xf32>
    %130 = arith.addf %128, %129 : vector<8x128xf32>
    %131 = arith.negf %130 : vector<8x128xf32>
    %132 = math.exp %131 : vector<8x128xf32>
    %cst_53 = arith.constant 1.000000e+00 : f32
    %133 = vector.broadcast %cst_53 : f32 to vector<8x128xf32>
    %134 = arith.addf %133, %132 : vector<8x128xf32>
    %135 = arith.divf %133, %134 : vector<8x128xf32>
    %136 = vector.extract_strided_slice %127 {offsets = [0, 128], sizes = [8, 128], strides = [1, 1]} : vector<8x384xf32> to vector<8x128xf32>
    %cst_54 = arith.constant dense<0.000000e+00> : vector<8x128xf32>
    %137 = tpu.matmul %120, %15, %cst_54 {dimension_numbers = #tpu.dot_dimension_numbers<[1], [0], [0], [1], [0, 0, 1, 1], [], []>} : vector<8x128xf32>, vector<128x128xf32>, vector<8x128xf32> -> vector<8x128xf32>
    %138 = arith.addf %136, %137 : vector<8x128xf32>
    %139 = arith.negf %138 : vector<8x128xf32>
    %140 = math.exp %139 : vector<8x128xf32>
    %cst_55 = arith.constant 1.000000e+00 : f32
    %141 = vector.broadcast %cst_55 : f32 to vector<8x128xf32>
    %142 = arith.addf %141, %140 : vector<8x128xf32>
    %143 = arith.divf %141, %142 : vector<8x128xf32>
    %cst_56 = arith.constant dense<0.000000e+00> : vector<8x128xf32>
    %144 = tpu.matmul %120, %17, %cst_56 {dimension_numbers = #tpu.dot_dimension_numbers<[1], [0], [0], [1], [0, 0, 1, 1], [], []>} : vector<8x128xf32>, vector<128x128xf32>, vector<8x128xf32> -> vector<8x128xf32>
    %145 = vector.extract_strided_slice %127 {offsets = [0, 256], sizes = [8, 128], strides = [1, 1]} : vector<8x384xf32> to vector<8x128xf32>
    %146 = vector.broadcast %18 : vector<1x128xf32> to vector<8x128xf32>
    %147 = arith.addf %144, %146 : vector<8x128xf32>
    %148 = arith.mulf %135, %147 : vector<8x128xf32>
    %149 = arith.addf %145, %148 : vector<8x128xf32>
    %150 = math.tanh %149 : vector<8x128xf32>
    %cst_57 = arith.constant 1.000000e+00 : f32
    %151 = vector.broadcast %cst_57 : f32 to vector<8x128xf32>
    %152 = arith.subf %151, %143 : vector<8x128xf32>
    %153 = arith.mulf %152, %150 : vector<8x128xf32>
    %154 = arith.mulf %143, %120 : vector<8x128xf32>
    %155 = arith.addf %153, %154 : vector<8x128xf32>
    %156 = arith.index_cast %c3_i32 : i32 to index
    %c0_58 = arith.constant 0 : index
    %c0_59 = arith.constant 0 : index
    %157 = vector.load %arg7[%156, %c0_58, %c0_59] : memref<8x8x128xf32, #tpu.memory_space<vmem>>, vector<1x8x128xf32>
    %158 = vector.shape_cast %157 : vector<1x8x128xf32> to vector<8x128xf32>
    %159 = vector.shape_cast %155 : vector<8x128xf32> to vector<1x8x128xf32>
    tpu.vector_store %arg7[%156, %c0_58, %c0_59], %159 {strides = array<i32>} : memref<8x8x128xf32, #tpu.memory_space<vmem>>, vector<1x8x128xf32>,
    %c4_i32 = arith.constant 4 : i32
    %c8_i32_60 = arith.constant 8 : i32
    %160 = arith.muli %c4_i32, %c8_i32_60 : i32
    %161 = arith.index_cast %160 : i32 to index
    %c0_61 = arith.constant 0 : index
    %162 = vector.load %arg8[%161, %c0_61] : memref<64x384xf32, #tpu.memory_space<vmem>>, vector<8x384xf32>
    %163 = vector.extract_strided_slice %162 {offsets = [0, 0], sizes = [8, 128], strides = [1, 1]} : vector<8x384xf32> to vector<8x128xf32>
    %cst_62 = arith.constant dense<0.000000e+00> : vector<8x128xf32>
    %164 = tpu.matmul %155, %13, %cst_62 {dimension_numbers = #tpu.dot_dimension_numbers<[1], [0], [0], [1], [0, 0, 1, 1], [], []>} : vector<8x128xf32>, vector<128x128xf32>, vector<8x128xf32> -> vector<8x128xf32>
    %165 = arith.addf %163, %164 : vector<8x128xf32>
    %166 = arith.negf %165 : vector<8x128xf32>
    %167 = math.exp %166 : vector<8x128xf32>
    %cst_63 = arith.constant 1.000000e+00 : f32
    %168 = vector.broadcast %cst_63 : f32 to vector<8x128xf32>
    %169 = arith.addf %168, %167 : vector<8x128xf32>
    %170 = arith.divf %168, %169 : vector<8x128xf32>
    %171 = vector.extract_strided_slice %162 {offsets = [0, 128], sizes = [8, 128], strides = [1, 1]} : vector<8x384xf32> to vector<8x128xf32>
    %cst_64 = arith.constant dense<0.000000e+00> : vector<8x128xf32>
    %172 = tpu.matmul %155, %15, %cst_64 {dimension_numbers = #tpu.dot_dimension_numbers<[1], [0], [0], [1], [0, 0, 1, 1], [], []>} : vector<8x128xf32>, vector<128x128xf32>, vector<8x128xf32> -> vector<8x128xf32>
    %173 = arith.addf %171, %172 : vector<8x128xf32>
    %174 = arith.negf %173 : vector<8x128xf32>
    %175 = math.exp %174 : vector<8x128xf32>
    %cst_65 = arith.constant 1.000000e+00 : f32
    %176 = vector.broadcast %cst_65 : f32 to vector<8x128xf32>
    %177 = arith.addf %176, %175 : vector<8x128xf32>
    %178 = arith.divf %176, %177 : vector<8x128xf32>
    %cst_66 = arith.constant dense<0.000000e+00> : vector<8x128xf32>
    %179 = tpu.matmul %155, %17, %cst_66 {dimension_numbers = #tpu.dot_dimension_numbers<[1], [0], [0], [1], [0, 0, 1, 1], [], []>} : vector<8x128xf32>, vector<128x128xf32>, vector<8x128xf32> -> vector<8x128xf32>
    %180 = vector.extract_strided_slice %162 {offsets = [0, 256], sizes = [8, 128], strides = [1, 1]} : vector<8x384xf32> to vector<8x128xf32>
    %181 = vector.broadcast %18 : vector<1x128xf32> to vector<8x128xf32>
    %182 = arith.addf %179, %181 : vector<8x128xf32>
    %183 = arith.mulf %170, %182 : vector<8x128xf32>
    %184 = arith.addf %180, %183 : vector<8x128xf32>
    %185 = math.tanh %184 : vector<8x128xf32>
    %cst_67 = arith.constant 1.000000e+00 : f32
    %186 = vector.broadcast %cst_67 : f32 to vector<8x128xf32>
    %187 = arith.subf %186, %178 : vector<8x128xf32>
    %188 = arith.mulf %187, %185 : vector<8x128xf32>
    %189 = arith.mulf %178, %155 : vector<8x128xf32>
    %190 = arith.addf %188, %189 : vector<8x128xf32>
    %191 = arith.index_cast %c4_i32 : i32 to index
    %c0_68 = arith.constant 0 : index
    %c0_69 = arith.constant 0 : index
    %192 = vector.load %arg7[%191, %c0_68, %c0_69] : memref<8x8x128xf32, #tpu.memory_space<vmem>>, vector<1x8x128xf32>
    %193 = vector.shape_cast %192 : vector<1x8x128xf32> to vector<8x128xf32>
    %194 = vector.shape_cast %190 : vector<8x128xf32> to vector<1x8x128xf32>
    tpu.vector_store %arg7[%191, %c0_68, %c0_69], %194 {strides = array<i32>} : memref<8x8x128xf32, #tpu.memory_space<vmem>>, vector<1x8x128xf32>,
    %c5_i32 = arith.constant 5 : i32
    %c8_i32_70 = arith.constant 8 : i32
    %195 = arith.muli %c5_i32, %c8_i32_70 : i32
    %196 = arith.index_cast %195 : i32 to index
    %c0_71 = arith.constant 0 : index
    %197 = vector.load %arg8[%196, %c0_71] : memref<64x384xf32, #tpu.memory_space<vmem>>, vector<8x384xf32>
    %198 = vector.extract_strided_slice %197 {offsets = [0, 0], sizes = [8, 128], strides = [1, 1]} : vector<8x384xf32> to vector<8x128xf32>
    %cst_72 = arith.constant dense<0.000000e+00> : vector<8x128xf32>
    %199 = tpu.matmul %190, %13, %cst_72 {dimension_numbers = #tpu.dot_dimension_numbers<[1], [0], [0], [1], [0, 0, 1, 1], [], []>} : vector<8x128xf32>, vector<128x128xf32>, vector<8x128xf32> -> vector<8x128xf32>
    %200 = arith.addf %198, %199 : vector<8x128xf32>
    %201 = arith.negf %200 : vector<8x128xf32>
    %202 = math.exp %201 : vector<8x128xf32>
    %cst_73 = arith.constant 1.000000e+00 : f32
    %203 = vector.broadcast %cst_73 : f32 to vector<8x128xf32>
    %204 = arith.addf %203, %202 : vector<8x128xf32>
    %205 = arith.divf %203, %204 : vector<8x128xf32>
    %206 = vector.extract_strided_slice %197 {offsets = [0, 128], sizes = [8, 128], strides = [1, 1]} : vector<8x384xf32> to vector<8x128xf32>
    %cst_74 = arith.constant dense<0.000000e+00> : vector<8x128xf32>
    %207 = tpu.matmul %190, %15, %cst_74 {dimension_numbers = #tpu.dot_dimension_numbers<[1], [0], [0], [1], [0, 0, 1, 1], [], []>} : vector<8x128xf32>, vector<128x128xf32>, vector<8x128xf32> -> vector<8x128xf32>
    %208 = arith.addf %206, %207 : vector<8x128xf32>
    %209 = arith.negf %208 : vector<8x128xf32>
    %210 = math.exp %209 : vector<8x128xf32>
    %cst_75 = arith.constant 1.000000e+00 : f32
    %211 = vector.broadcast %cst_75 : f32 to vector<8x128xf32>
    %212 = arith.addf %211, %210 : vector<8x128xf32>
    %213 = arith.divf %211, %212 : vector<8x128xf32>
    %cst_76 = arith.constant dense<0.000000e+00> : vector<8x128xf32>
    %214 = tpu.matmul %190, %17, %cst_76 {dimension_numbers = #tpu.dot_dimension_numbers<[1], [0], [0], [1], [0, 0, 1, 1], [], []>} : vector<8x128xf32>, vector<128x128xf32>, vector<8x128xf32> -> vector<8x128xf32>
    %215 = vector.extract_strided_slice %197 {offsets = [0, 256], sizes = [8, 128], strides = [1, 1]} : vector<8x384xf32> to vector<8x128xf32>
    %216 = vector.broadcast %18 : vector<1x128xf32> to vector<8x128xf32>
    %217 = arith.addf %214, %216 : vector<8x128xf32>
    %218 = arith.mulf %205, %217 : vector<8x128xf32>
    %219 = arith.addf %215, %218 : vector<8x128xf32>
    %220 = math.tanh %219 : vector<8x128xf32>
    %cst_77 = arith.constant 1.000000e+00 : f32
    %221 = vector.broadcast %cst_77 : f32 to vector<8x128xf32>
    %222 = arith.subf %221, %213 : vector<8x128xf32>
    %223 = arith.mulf %222, %220 : vector<8x128xf32>
    %224 = arith.mulf %213, %190 : vector<8x128xf32>
    %225 = arith.addf %223, %224 : vector<8x128xf32>
    %226 = arith.index_cast %c5_i32 : i32 to index
    %c0_78 = arith.constant 0 : index
    %c0_79 = arith.constant 0 : index
    %227 = vector.load %arg7[%226, %c0_78, %c0_79] : memref<8x8x128xf32, #tpu.memory_space<vmem>>, vector<1x8x128xf32>
    %228 = vector.shape_cast %227 : vector<1x8x128xf32> to vector<8x128xf32>
    %229 = vector.shape_cast %225 : vector<8x128xf32> to vector<1x8x128xf32>
    tpu.vector_store %arg7[%226, %c0_78, %c0_79], %229 {strides = array<i32>} : memref<8x8x128xf32, #tpu.memory_space<vmem>>, vector<1x8x128xf32>,
    %c6_i32 = arith.constant 6 : i32
    %c8_i32_80 = arith.constant 8 : i32
    %230 = arith.muli %c6_i32, %c8_i32_80 : i32
    %231 = arith.index_cast %230 : i32 to index
    %c0_81 = arith.constant 0 : index
    %232 = vector.load %arg8[%231, %c0_81] : memref<64x384xf32, #tpu.memory_space<vmem>>, vector<8x384xf32>
    %233 = vector.extract_strided_slice %232 {offsets = [0, 0], sizes = [8, 128], strides = [1, 1]} : vector<8x384xf32> to vector<8x128xf32>
    %cst_82 = arith.constant dense<0.000000e+00> : vector<8x128xf32>
    %234 = tpu.matmul %225, %13, %cst_82 {dimension_numbers = #tpu.dot_dimension_numbers<[1], [0], [0], [1], [0, 0, 1, 1], [], []>} : vector<8x128xf32>, vector<128x128xf32>, vector<8x128xf32> -> vector<8x128xf32>
    %235 = arith.addf %233, %234 : vector<8x128xf32>
    %236 = arith.negf %235 : vector<8x128xf32>
    %237 = math.exp %236 : vector<8x128xf32>
    %cst_83 = arith.constant 1.000000e+00 : f32
    %238 = vector.broadcast %cst_83 : f32 to vector<8x128xf32>
    %239 = arith.addf %238, %237 : vector<8x128xf32>
    %240 = arith.divf %238, %239 : vector<8x128xf32>
    %241 = vector.extract_strided_slice %232 {offsets = [0, 128], sizes = [8, 128], strides = [1, 1]} : vector<8x384xf32> to vector<8x128xf32>
    %cst_84 = arith.constant dense<0.000000e+00> : vector<8x128xf32>
    %242 = tpu.matmul %225, %15, %cst_84 {dimension_numbers = #tpu.dot_dimension_numbers<[1], [0], [0], [1], [0, 0, 1, 1], [], []>} : vector<8x128xf32>, vector<128x128xf32>, vector<8x128xf32> -> vector<8x128xf32>
    %243 = arith.addf %241, %242 : vector<8x128xf32>
    %244 = arith.negf %243 : vector<8x128xf32>
    %245 = math.exp %244 : vector<8x128xf32>
    %cst_85 = arith.constant 1.000000e+00 : f32
    %246 = vector.broadcast %cst_85 : f32 to vector<8x128xf32>
    %247 = arith.addf %246, %245 : vector<8x128xf32>
    %248 = arith.divf %246, %247 : vector<8x128xf32>
    %cst_86 = arith.constant dense<0.000000e+00> : vector<8x128xf32>
    %249 = tpu.matmul %225, %17, %cst_86 {dimension_numbers = #tpu.dot_dimension_numbers<[1], [0], [0], [1], [0, 0, 1, 1], [], []>} : vector<8x128xf32>, vector<128x128xf32>, vector<8x128xf32> -> vector<8x128xf32>
    %250 = vector.extract_strided_slice %232 {offsets = [0, 256], sizes = [8, 128], strides = [1, 1]} : vector<8x384xf32> to vector<8x128xf32>
    %251 = vector.broadcast %18 : vector<1x128xf32> to vector<8x128xf32>
    %252 = arith.addf %249, %251 : vector<8x128xf32>
    %253 = arith.mulf %240, %252 : vector<8x128xf32>
    %254 = arith.addf %250, %253 : vector<8x128xf32>
    %255 = math.tanh %254 : vector<8x128xf32>
    %cst_87 = arith.constant 1.000000e+00 : f32
    %256 = vector.broadcast %cst_87 : f32 to vector<8x128xf32>
    %257 = arith.subf %256, %248 : vector<8x128xf32>
    %258 = arith.mulf %257, %255 : vector<8x128xf32>
    %259 = arith.mulf %248, %225 : vector<8x128xf32>
    %260 = arith.addf %258, %259 : vector<8x128xf32>
    %261 = arith.index_cast %c6_i32 : i32 to index
    %c0_88 = arith.constant 0 : index
    %c0_89 = arith.constant 0 : index
    %262 = vector.load %arg7[%261, %c0_88, %c0_89] : memref<8x8x128xf32, #tpu.memory_space<vmem>>, vector<1x8x128xf32>
    %263 = vector.shape_cast %262 : vector<1x8x128xf32> to vector<8x128xf32>
    %264 = vector.shape_cast %260 : vector<8x128xf32> to vector<1x8x128xf32>
    tpu.vector_store %arg7[%261, %c0_88, %c0_89], %264 {strides = array<i32>} : memref<8x8x128xf32, #tpu.memory_space<vmem>>, vector<1x8x128xf32>,
    %c7_i32 = arith.constant 7 : i32
    %c8_i32_90 = arith.constant 8 : i32
    %265 = arith.muli %c7_i32, %c8_i32_90 : i32
    %266 = arith.index_cast %265 : i32 to index
    %c0_91 = arith.constant 0 : index
    %267 = vector.load %arg8[%266, %c0_91] : memref<64x384xf32, #tpu.memory_space<vmem>>, vector<8x384xf32>
    %268 = vector.extract_strided_slice %267 {offsets = [0, 0], sizes = [8, 128], strides = [1, 1]} : vector<8x384xf32> to vector<8x128xf32>
    %cst_92 = arith.constant dense<0.000000e+00> : vector<8x128xf32>
    %269 = tpu.matmul %260, %13, %cst_92 {dimension_numbers = #tpu.dot_dimension_numbers<[1], [0], [0], [1], [0, 0, 1, 1], [], []>} : vector<8x128xf32>, vector<128x128xf32>, vector<8x128xf32> -> vector<8x128xf32>
    %270 = arith.addf %268, %269 : vector<8x128xf32>
    %271 = arith.negf %270 : vector<8x128xf32>
    %272 = math.exp %271 : vector<8x128xf32>
    %cst_93 = arith.constant 1.000000e+00 : f32
    %273 = vector.broadcast %cst_93 : f32 to vector<8x128xf32>
    %274 = arith.addf %273, %272 : vector<8x128xf32>
    %275 = arith.divf %273, %274 : vector<8x128xf32>
    %276 = vector.extract_strided_slice %267 {offsets = [0, 128], sizes = [8, 128], strides = [1, 1]} : vector<8x384xf32> to vector<8x128xf32>
    %cst_94 = arith.constant dense<0.000000e+00> : vector<8x128xf32>
    %277 = tpu.matmul %260, %15, %cst_94 {dimension_numbers = #tpu.dot_dimension_numbers<[1], [0], [0], [1], [0, 0, 1, 1], [], []>} : vector<8x128xf32>, vector<128x128xf32>, vector<8x128xf32> -> vector<8x128xf32>
    %278 = arith.addf %276, %277 : vector<8x128xf32>
    %279 = arith.negf %278 : vector<8x128xf32>
    %280 = math.exp %279 : vector<8x128xf32>
    %cst_95 = arith.constant 1.000000e+00 : f32
    %281 = vector.broadcast %cst_95 : f32 to vector<8x128xf32>
    %282 = arith.addf %281, %280 : vector<8x128xf32>
    %283 = arith.divf %281, %282 : vector<8x128xf32>
    %cst_96 = arith.constant dense<0.000000e+00> : vector<8x128xf32>
    %284 = tpu.matmul %260, %17, %cst_96 {dimension_numbers = #tpu.dot_dimension_numbers<[1], [0], [0], [1], [0, 0, 1, 1], [], []>} : vector<8x128xf32>, vector<128x128xf32>, vector<8x128xf32> -> vector<8x128xf32>
    %285 = vector.extract_strided_slice %267 {offsets = [0, 256], sizes = [8, 128], strides = [1, 1]} : vector<8x384xf32> to vector<8x128xf32>
    %286 = vector.broadcast %18 : vector<1x128xf32> to vector<8x128xf32>
    %287 = arith.addf %284, %286 : vector<8x128xf32>
    %288 = arith.mulf %275, %287 : vector<8x128xf32>
    %289 = arith.addf %285, %288 : vector<8x128xf32>
    %290 = math.tanh %289 : vector<8x128xf32>
    %cst_97 = arith.constant 1.000000e+00 : f32
    %291 = vector.broadcast %cst_97 : f32 to vector<8x128xf32>
    %292 = arith.subf %291, %283 : vector<8x128xf32>
    %293 = arith.mulf %292, %290 : vector<8x128xf32>
    %294 = arith.mulf %283, %260 : vector<8x128xf32>
    %295 = arith.addf %293, %294 : vector<8x128xf32>
    %296 = arith.index_cast %c7_i32 : i32 to index
    %c0_98 = arith.constant 0 : index
    %c0_99 = arith.constant 0 : index
    %297 = vector.load %arg7[%296, %c0_98, %c0_99] : memref<8x8x128xf32, #tpu.memory_space<vmem>>, vector<1x8x128xf32>
    %298 = vector.shape_cast %297 : vector<1x8x128xf32> to vector<8x128xf32>
    %299 = vector.shape_cast %295 : vector<8x128xf32> to vector<1x8x128xf32>
    tpu.vector_store %arg7[%296, %c0_98, %c0_99], %299 {strides = array<i32>} : memref<8x8x128xf32, #tpu.memory_space<vmem>>, vector<1x8x128xf32>,
    %c8_i32_100 = arith.constant 8 : i32
    %c0_101 = arith.constant 0 : index
    %c0_102 = arith.constant 0 : index
    %300 = vector.load %arg9[%c0_101, %c0_102] : memref<8x128xf32, #tpu.memory_space<vmem>>, vector<8x128xf32>
    tpu.vector_store %arg9[%c0_101, %c0_102], %295 {strides = array<i32>} : memref<8x128xf32, #tpu.memory_space<vmem>>, vector<8x128xf32>,
    return
  }
  func.func @transform_0(%arg0: i32, %arg1: i32) -> (i32, i32, i32) {
    %c0_i32 = arith.constant 0 : i32
    %c0_i32_0 = arith.constant 0 : i32
    return %arg1, %arg0, %c0_i32 : i32, i32, i32
  }
  func.func @transform_1(%arg0: i32, %arg1: i32) -> (i32, i32) {
    %c0_i32 = arith.constant 0 : i32
    %c0_i32_0 = arith.constant 0 : i32
    %c0_i32_1 = arith.constant 0 : i32
    return %c0_i32, %c0_i32_0 : i32, i32
  }
  func.func @transform_2(%arg0: i32, %arg1: i32) -> (i32, i32, i32) {
    %c0_i32 = arith.constant 0 : i32
    %c0_i32_0 = arith.constant 0 : i32
    %c0_i32_1 = arith.constant 0 : i32
    %c0_i32_2 = arith.constant 0 : i32
    return %c0_i32, %c0_i32_0, %c0_i32_1 : i32, i32, i32
  }
  func.func @transform_3(%arg0: i32, %arg1: i32) -> (i32, i32) {
    %c0_i32 = arith.constant 0 : i32
    %c0_i32_0 = arith.constant 0 : i32
    %c0_i32_1 = arith.constant 0 : i32
    return %c0_i32, %c0_i32_0 : i32, i32
  }
  func.func @transform_4(%arg0: i32, %arg1: i32) -> (i32, i32) {
    %c0_i32 = arith.constant 0 : i32
    %c0_i32_0 = arith.constant 0 : i32
    %c0_i32_1 = arith.constant 0 : i32
    return %c0_i32, %c0_i32_0 : i32, i32
  }
  func.func @transform_5(%arg0: i32, %arg1: i32) -> (i32, i32, i32) {
    %c0_i32 = arith.constant 0 : i32
    %c0_i32_0 = arith.constant 0 : i32
    return %arg1, %arg0, %c0_i32 : i32, i32, i32
  }
}

</mosaic_0001>

<bundles_post_ra>
// kernel: tpu_custom_call.1
= control target key start
LH: loop header
LB: loop body
LE: loop exit
PB: predicated region body
PF: predicated region fallthrough
CT: control target
= control target key end

     0   :  { %10 = vsyncpa [#allocation5], 0  ;;  %s2396_s0 = inlined_call_operand.hbm [shape: bf16[8,8,32], index: 0, kind: input, shape index: {}]   ;;  %s2397_s1 = inlined_call_operand.hbm [shape: f32[32,384], index: 1, kind: input, shape index: {}]   ;;  %s2398_s2 = inlined_call_operand.hbm [shape: f32[3,128,128], index: 2, kind: input, shape index: {}]   ;;  %s2399_s3 = inlined_call_operand.hbm [shape: f32[1,384], index: 3, kind: input, shape index: {}]   ;;  %s2400_s4 = inlined_call_operand.vmem [shape: f32[1,128], index: 4, kind: input, shape index: {}]   ;;  %s2401_s5 = inlined_call_operand.hbm [shape: f32[8,8,128], index: 5, kind: output, shape index: {}]  }
   0x1   :  { %11 = vsyncpa [#allocation8], 0 }
   0x2   :  { %12 = vsyncpa [#allocation11], 0  ;;  %s31_s20 = sshll.u32 %s2397_s1, 4  ;;  %s32_s20 = int_to_ptr.hbm [resolvable:$true] %s31_s20 }
   0x3   :  { %13 = vsyncpa [#allocation6], 0  ;;  %s1604_s21 = smov [#allocation7]   ;;  %s18_s25 = sshll.u32 %s2396_s0, 4  ;;  %s19_s25 = int_to_ptr.hbm [resolvable:$true] %s18_s25 }
   0x4   :  { %s33_s22 = sshll.u32 %s1604_s21, 4  ;;  %s1605_s26 = smov 384   ;;  %s34_s22 = int_to_ptr.vmem [resolvable:$true] %s33_s22 }
   0x5   :  { %s1606_s27 = smov 24   ;;  %s1607_s28 = smov [#allocation4]  }
   0x6   :  { %39 = dma.hbm_to_vmem [thread:$0]  %s32_s20, 1536, %s34_s22, [#allocation8], %s1605_s26, %s1605_s26, %s1606_s27  }
   0x7   :  { %s20_s29 = sshll.u32 %s1607_s28, 4  ;;  %s1608_s30 = smov 64   ;;  %s21_s29 = int_to_ptr.vmem [resolvable:$true] %s20_s29 }
   0x8   :  { %s1609_s6 = smov 4   ;;  %s44_s8 = sshll.u32 %s2398_s2, 4  ;;  %s45_s8 = int_to_ptr.hbm [resolvable:$true] %s44_s8 }
   0x9   :  { %26 = dma.hbm_to_vmem [thread:$0]  %s19_s25, 512, %s21_s29, [#allocation5], %s1608_s30, %s1608_s30, %s1609_s6  }
   0xa   :  { %s1610_s9 = smov [#allocation9]   ;;  %s58_s12 = sshll.u32 %s2399_s3, 4  ;;  %s59_s12 = int_to_ptr.hbm [resolvable:$true] %s58_s12 }
   0xb   :  { %s46_s10 = sshll.u32 %s1610_s9, 4  ;;  %s1611_s13 = smov 128   ;;  %s47_s10 = int_to_ptr.vmem [resolvable:$true] %s46_s10 }
   0xc   :  { %s1612_s14 = smov 8   ;;  %s1613_s15 = smov [#allocation10]  }
   0xd   :  { %52 = dma.hbm_to_vmem [thread:$0]  %s45_s8, 6144, %s47_s10, [#allocation8], %s1611_s13, %s1611_s13, %s1612_s14  }
   0xe   :  { %s60_s16 = sshll.u32 %s1613_s15, 4  ;;  %s61_s16 = int_to_ptr.vmem [resolvable:$true] %s60_s16 }
   0xf   :  { %63 = dma.hbm_to_vmem [thread:$0]  %s59_s12, 48, %s61_s16, [#allocation11]  }
  0x10   :  { %1596 = dma.done.wait [#allocation5], 512  }
  0x11   :  { %1597 = vsyncadd [#allocation5], 4294966784 }
  0x12   :  { %1598 = dma.done.wait [#allocation8], 7680  }
  0x13   :  { %1599 = vsyncadd [#allocation8], 4294959616 }
  0x14   :  { %1600 = dma.done.wait [#allocation11], 48  }
  0x15   :  { %1601 = vsyncadd [#allocation11], 4294967248  ;;  %v1661_v0 = vld [vmem:[#allocation9 + $0x78] sm:$0xff]  ;;  %v112_v1 = vld [vmem:[#allocation7 + $0x48] sm:$0xff]  ;;  %vm123_vm0 = vcmask 261120   ;;  %v1614_v49 = vmov 0.0  }
  0x16   :  { %v1663_v2 = vld [vmem:[#allocation9 + $0x70] sm:$0xff]  ;;  %350 = vmatpush.msra.mxu3 %v1661_v0  ;;  %160 = vmatpush.msra.mxu0 %v112_v1  ;;  %v1666_v4 = vld [vmem:[#allocation9 + $0x68] sm:$0xff]  ;;  %v106_v5 = vld [vmem:[#allocation7 + $0x18] sm:$0xff]  ;;  %s1252_s22 = sshll.u32 %s2401_s5, 4  ;;  %s1253_s22 = int_to_ptr.hbm [resolvable:$true] %s1252_s22 }
  0x17   :  { %v109_v3 = vld [vmem:[#allocation7 + $0x30] sm:$0xff]  ;;  %1326 = vmatpush.msra.mxu2 %v112_v1  ;;  %v1308_v6 = vld [vmem:[#allocation4] sm:$0xff]   ;;  %v1674_v10 = vld [vmem:[#allocation9 + $0x58] sm:$0xff] }
  0x18   :  { %351 = vmatpush.msra.mxu3 %v1663_v2  ;;  %161 = vmatpush.msra.mxu0 %v109_v3  ;;  %v1669_v7 = vld [vmem:[#allocation9 + $0x60] sm:$0xff]  ;;  %v1671_v9 = vunpack.c.l.bf16 %v1308_v6  ;;  %v1677_v11 = vld [vmem:[#allocation9 + $0x178] sm:$0xff]  ;;  %v1681_v12 = vld [vmem:[#allocation9 + $0x50] sm:$0xff]  ;;  %v1695_v17 = vunpack.c.h.bf16 %v1308_v6 }
  0x19   :  { %v103_v8 = vld [vmem:[#allocation7] sm:$0xff]  ;;  %1327 = vmatpush.msra.mxu2 %v109_v3  ;;  %v1683_v13 = vld [vmem:[#allocation9 + $0x170] sm:$0xff]  ;;  %v1687_v14 = vld [vmem:[#allocation9 + $0x48] sm:$0xff] }
  0x1a   :  { %352 = vmatpush.msra.mxu3 %v1666_v4  ;;  %162 = vmatpush.msra.mxu0 %v106_v5  ;;  %v1689_v15 = vld [vmem:[#allocation9 + $0x168] sm:$0xff]  ;;  %v1693_v16 = vld [vmem:[#allocation9 + $0x40] sm:$0xff]  ;;  %v1699_v19 = vld [vmem:[#allocation4 + $0x18] sm:$0xff]  }
  0x1b   :  { %1328 = vmatpush.msra.mxu2 %v106_v5  ;;  %v1697_v18 = vld [vmem:[#allocation9 + $0x160] sm:$0xff]  ;;  %v1704_v20 = vunpack.c.h.bf16 %v1699_v19  ;;  %v1706_v21 = vld [vmem:[#allocation9 + $0x38] sm:$0xff]  ;;  %v113_v23 = vld [vmem:[#allocation7 + $0x50] sm:$0xff] }
  0x1c   :  { %353 = vmatpush.msra.mxu3 %v1669_v7  ;;  %163 = vmatpush.msra.mxu0 %v103_v8  ;;  %v1708_v22 = vld [vmem:[#allocation9 + $0x158] sm:$0xff]  ;;  %v1714_v24 = vld [vmem:[#allocation9 + $0x30] sm:$0xff]  ;;  %v1323_v26 = vld [vmem:[#allocation4 + $0x8] sm:$0xff]  }
  0x1d   :  { %1267 = vmatmul.msk.f32.vlgmr.msra.gmra.mxu0 %vm123_vm0, %v1671_v9  ;;  %1329 = vmatpush.msra.mxu2 %v103_v8  ;;  %v1716_v25 = vld [vmem:[#allocation9 + $0x150] sm:$0xff]  ;;  %v110_v27 = vld [vmem:[#allocation7 + $0x38] sm:$0xff]  ;;  %v1722_v28 = vld [vmem:[#allocation9 + $0x28] sm:$0xff]  ;;  %v1730_v32 = vunpack.c.l.bf16 %v1323_v26  ;;  %v1760_v44 = vunpack.c.h.bf16 %v1323_v26  ;;  %v1853_v8 = vunpack.c.l.bf16 %v1699_v19 }
  0x1e   :  { %354 = vmatpush.msra.mxu3 %v1674_v10  ;;  %433 = vmatpush.msrb.mxu0 %v1677_v11  ;;  %v1724_v29 = vld [vmem:[#allocation9 + $0x148] sm:$0xff]  ;;  %v107_v30 = vld [vmem:[#allocation7 + $0x20] sm:$0xff]  ;;  %v1736_v35 = vld [vmem:[#allocation9 + $0x18] sm:$0xff] }
  0x1f   :  { %1274 = vmatmul.msk.f32.vlgmr.msra.gmra.mxu2 %vm123_vm0, %v1704_v20  ;;  %201 = vmatpush.msra.mxu1 %v113_v23  ;;  %v1728_v31 = vld [vmem:[#allocation9 + $0x20] sm:$0xff]  ;;  %v104_v34 = vld [vmem:[#allocation7 + $0x8] sm:$0xff]  ;;  %v1738_v36 = vld [vmem:[#allocation9 + $0x138] sm:$0xff] }
  0x20   :  { %355 = vmatpush.msra.mxu3 %v1681_v12  ;;  %434 = vmatpush.msrb.mxu0 %v1683_v13  ;;  %v1732_v33 = vld [vmem:[#allocation9 + $0x140] sm:$0xff]  ;;  %v1744_v37 = vld [vmem:[#allocation9 + $0x10] sm:$0xff]  ;;  %v114_v39 = vld [vmem:[#allocation7 + $0x58] sm:$0xff] }
  0x21   :  { %1330 = vmatpush.msrb.mxu2 %v113_v23  ;;  %202 = vmatpush.msra.mxu1 %v110_v27  ;;  %2422 = vst [vmem:[#allocation17_spill] sm:$0xff] %v1744_v37  ;;  %v1746_v38 = vld [vmem:[#allocation9 + $0x130] sm:$0xff]  ;;  %v1750_v40 = vld [vmem:[#allocation9 + $0x8] sm:$0xff]  ;;  %v111_v42 = vld [vmem:[#allocation7 + $0x40] sm:$0xff] }
  0x22   :  { %356 = vmatpush.msra.mxu3 %v1687_v14  ;;  %435 = vmatpush.msrb.mxu0 %v1689_v15  ;;  %2423 = vst [vmem:[#allocation18_spill] sm:$0xff] %v1750_v40  ;;  %v1754_v41 = vld [vmem:[#allocation9 + $0x128] sm:$0xff]  ;;  %v1758_v43 = vld [vmem:[#allocation9] sm:$0xff]  ;;  %v1768_v46 = vld [vmem:[#allocation9 + $0xf8] sm:$0xff] }
  0x23   :  { %1331 = vmatpush.msrb.mxu2 %v110_v27  ;;  %203 = vmatpush.msra.mxu1 %v107_v30  ;;  %2424 = vst [vmem:[#allocation19_spill] sm:$0xff] %v1758_v43  ;;  %v1762_v45 = vld [vmem:[#allocation9 + $0x120] sm:$0xff]  ;;  %v108_v47 = vld [vmem:[#allocation7 + $0x28] sm:$0xff]  ;;  %v1773_v48 = vld [vmem:[#allocation9 + $0x118] sm:$0xff] }
  0x24   :  { %357 = vmatpush.msra.mxu3 %v1693_v16  ;;  %436 = vmatpush.msrb.mxu0 %v1697_v18  ;;  %v1778_v50 = vld [vmem:[#allocation9 + $0xf0] sm:$0xff]  ;;  %v1783_v54 = vld [vmem:[#allocation9 + $0xe8] sm:$0xff]  ;;  %v1790_v56 = vld [vmem:[#allocation9 + $0xe0] sm:$0xff] }
  0x25   :  { %1268 = vmatmul.msk.f32.gmra.mxu0 %vm123_vm0, %v1695_v17  ;;  %1332 = vmatpush.msrb.mxu2 %v107_v30  ;;  %v105_v51 = vld [vmem:[#allocation7 + $0x10] sm:$0xff]  ;;  %v1788_v55 = vld [vmem:[#allocation9 + $0x108] sm:$0xff]  ;;  %v1799_v58 = vld [vmem:[#allocation9 + $0xd8] sm:$0xff] }
  0x26   :  { %358 = vmatpush.msra.mxu3 %v1706_v21  ;;  %437 = vmatpush.msrb.mxu0 %v1708_v22  ;;  %v1324_v52 = vld [vmem:[#allocation4 + $0x10] sm:$0xff]   ;;  %2426 = vst [vmem:[#allocation21_spill] sm:$0xff] %v1788_v55  ;;  %v1802_v59 = vld [vmem:[#allocation9 + $0x100] sm:$0xff]  ;;  %v1815_v61 = vld [vmem:[#allocation9 + $0xc8] sm:$0xff] }
  0x27   :  { %1333 = vmatpush.msrb.mxu2 %v104_v34  ;;  %204 = vmatpush.msra.mxu1 %v104_v34  ;;  %v1781_v53 = vld [vmem:[#allocation9 + $0x110] sm:$0xff]  ;;  %v1792_v57 = vunpack.c.l.bf16 %v1324_v52  ;;  %2427 = vst [vmem:[#allocation22_spill] sm:$0xff] %v1802_v59  ;;  %v1821_v62 = vld [vmem:[#allocation9 + $0xc0] sm:$0xff]  ;;  %v1823_v63 = vunpack.c.h.bf16 %v1324_v52  ;;  %v1830_v1 = vld [vmem:[#allocation9 + $0xb8] sm:$0xff] }
  0x28   :  { %359 = vmatpush.msra.mxu3 %v1714_v24  ;;  %438 = vmatpush.msrb.mxu0 %v1716_v25  ;;  %2425 = vst [vmem:[#allocation20_spill] sm:$0xff] %v1781_v53  ;;  %v1809_v60 = vld [vmem:[#allocation9 + $0xd0] sm:$0xff]  ;;  %v1844_v5 = vld [vmem:[#allocation9 + $0xa8] sm:$0xff]  ;;  %v1850_v6 = vld [vmem:[#allocation9 + $0xa0] sm:$0xff] }
  0x29   :  { %1282 = vmatmul.msk.f32.vlgmr.msrb.gmra.mxu2 %vm123_vm0, %v1704_v20  ;;  %1275 = vmatmul.msk.f32.vlgmr.msra.gmra.mxu1 %vm123_vm0, %v1671_v9  ;;  %v1838_v3 = vld [vmem:[#allocation9 + $0xb0] sm:$0xff]  ;;  %v1874_v19 = vld [vmem:[#allocation9 + $0x88] sm:$0xff]  ;;  %v1880_v23 = vld [vmem:[#allocation9 + $0x80] sm:$0xff] }
  0x2a   :  { %360 = vmatpush.msra.mxu3 %v1722_v28  ;;  %439 = vmatpush.msrb.mxu0 %v1724_v29  ;;  %2430 = vst [vmem:[#allocation25_spill] sm:$0xff] %v1874_v19  ;;  %v115_v26 = vld [vmem:[#allocation10] sm:$0x7] }
  0x2b   :  { %242 = vmatpush.msra.mxu2 %v114_v39  ;;  %464 = vmatpush.msrb.mxu1 %v1661_v0  ;;  %2431 = vst [vmem:[#allocation26_spill] sm:$0xff] %v1880_v23  ;;  %v117_v27 = vperm.slane %v115_v26, 0 }
  0x2c   :  { %361 = vmatpush.msra.mxu3 %v1728_v31  ;;  %440 = vmatpush.msrb.mxu0 %v1732_v33 }
  0x2d   :  { %1269 = vmatmul.msk.f32.gmra.mxu0 %vm123_vm0, %v1730_v32  ;;  %243 = vmatpush.msra.mxu2 %v111_v42 }
  0x2e   :  { %362 = vmatpush.msra.mxu3 %v1736_v35  ;;  %441 = vmatpush.msrb.mxu0 %v1738_v36 }
  0x2f   :  { %244 = vmatpush.msra.mxu2 %v108_v47  ;;  %465 = vmatpush.msrb.mxu1 %v1663_v2 }
  0x30   :  { %363 = vmatpush.msra.mxu3 %v1744_v37  ;;  %442 = vmatpush.msrb.mxu0 %v1746_v38 }
  0x31   :  { %245 = vmatpush.msra.mxu2 %v105_v51  ;;  %466 = vmatpush.msrb.mxu1 %v1666_v4 }
  0x32   :  { %364 = vmatpush.msra.mxu3 %v1750_v40  ;;  %443 = vmatpush.msrb.mxu0 %v1754_v41 }
  0x33   :  { %1283 = vmatmul.msk.f32.vlgmr.msra.gmra.mxu2 %vm123_vm0, %v1671_v9  ;;  %1276 = vmatmul.msk.f32.gmra.mxu1 %vm123_vm0, %v1695_v17  ;;  %v1860_v9 = vld [vmem:[#allocation9 + $0x98] sm:$0xff] }
  0x34   :  { %365 = vmatpush.msra.mxu3 %v1758_v43  ;;  %444 = vmatpush.msrb.mxu0 %v1762_v45  ;;  %2428 = vst [vmem:[#allocation23_spill] sm:$0xff] %v1860_v9 }
  0x35   :  { %366 = vmatmul.f32.vlgmr.msra.gmra.mxu3 %v1614_v49  ;;  %1270 = vmatmul.msk.f32.gmra.mxu0 %vm123_vm0, %v1760_v44 }
  0x36   :  { %390 = vmatpush.msrb.mxu3 %v1768_v46  ;;  %445 = vmatpush.msrb.mxu0 %v1773_v48 }
  0x37   :  { %504 = vmatpush.msrb.mxu2 %v1768_v46  ;;  %467 = vmatpush.msrb.mxu1 %v1669_v7 }
  0x38   :  { %391 = vmatpush.msrb.mxu3 %v1778_v50  ;;  %446 = vmatpush.msrb.mxu0 %v1781_v53 }
  0x39   :  { %505 = vmatpush.msrb.mxu2 %v1778_v50  ;;  %468 = vmatpush.msrb.mxu1 %v1674_v10 }
  0x3a   :  { %392 = vmatpush.msrb.mxu3 %v1783_v54  ;;  %447 = vmatpush.msrb.mxu0 %v1788_v55 }
  0x3b   :  { %506 = vmatpush.msrb.mxu2 %v1783_v54  ;;  %469 = vmatpush.msrb.mxu1 %v1681_v12 }
  0x3c   :  { %393 = vmatpush.msrb.mxu3 %v1790_v56  ;;  %448 = vmatpush.msrb.mxu0 %v1802_v59 }
  0x3d   :  { %1271 = vmatmul.msk.f32.gmra.mxu0 %vm123_vm0, %v1792_v57  ;;  %1284 = vmatmul.msk.f32.gmra.mxu2 %vm123_vm0, %v1695_v17  ;;  %v1868_v17 = vld [vmem:[#allocation9 + $0x90] sm:$0xff] }
  0x3e   :  { %394 = vmatpush.msrb.mxu3 %v1799_v58  ;;  %576 = vmatpush.msra.mxu0 %v1661_v0  ;;  %2429 = vst [vmem:[#allocation24_spill] sm:$0xff] %v1868_v17 }
  0x3f   :  { %507 = vmatpush.msrb.mxu2 %v1790_v56  ;;  %1277 = vmatmul.msk.f32.gmra.mxu1 %vm123_vm0, %v1730_v32 }
  0x40   :  { %395 = vmatpush.msrb.mxu3 %v1809_v60  ;;  %577 = vmatpush.msra.mxu0 %v1663_v2 }
  0x41   :  { %508 = vmatpush.msrb.mxu2 %v1799_v58  ;;  %470 = vmatpush.msrb.mxu1 %v1687_v14 }
  0x42   :  { %396 = vmatpush.msrb.mxu3 %v1815_v61  ;;  %578 = vmatpush.msra.mxu0 %v1666_v4 }
  0x43   :  { %509 = vmatpush.msrb.mxu2 %v1809_v60  ;;  %471 = vmatpush.msrb.mxu1 %v1693_v16 }
  0x44   :  { %397 = vmatpush.msrb.mxu3 %v1821_v62  ;;  %579 = vmatpush.msra.mxu0 %v1669_v7 }
  0x45   :  { %1272 = vmatmul.msk.f32.gmra.mxu0 %vm123_vm0, %v1823_v63  ;;  %510 = vmatpush.msrb.mxu2 %v1815_v61 }
  0x46   :  { %398 = vmatpush.msrb.mxu3 %v1830_v1  ;;  %1285 = vmatmul.msk.f32.gmra.mxu2 %vm123_vm0, %v1730_v32 }
  0x47   :  { %511 = vmatpush.msrb.mxu2 %v1821_v62  ;;  %472 = vmatpush.msrb.mxu1 %v1706_v21 }
  0x48   :  { %399 = vmatpush.msrb.mxu3 %v1838_v3  ;;  %1278 = vmatmul.msk.f32.gmra.mxu1 %vm123_vm0, %v1760_v44 }
  0x49   :  { %512 = vmatpush.msrb.mxu2 %v1830_v1  ;;  %473 = vmatpush.msrb.mxu1 %v1714_v24 }
  0x4a   :  { %400 = vmatpush.msrb.mxu3 %v1844_v5  ;;  %580 = vmatpush.msra.mxu0 %v1674_v10 }
  0x4b   :  { %513 = vmatpush.msrb.mxu2 %v1838_v3  ;;  %474 = vmatpush.msrb.mxu1 %v1722_v28 }
  0x4c   :  { %401 = vmatpush.msrb.mxu3 %v1850_v6  ;;  %581 = vmatpush.msra.mxu0 %v1681_v12 }
  0x4d   :  { %1273 = vmatmul.msk.f32.gmra.mxu0 %vm123_vm0, %v1853_v8  ;;  %514 = vmatpush.msrb.mxu2 %v1844_v5 }
  0x4e   :  { %402 = vmatpush.msrb.mxu3 %v1860_v9  ;;  %1286 = vmatmul.msk.f32.gmra.mxu2 %vm123_vm0, %v1760_v44 }
  0x4f   :  { %515 = vmatpush.msrb.mxu2 %v1850_v6  ;;  %475 = vmatpush.msrb.mxu1 %v1728_v31 }
  0x50   :  { %403 = vmatpush.msrb.mxu3 %v1868_v17  ;;  %1279 = vmatmul.msk.f32.gmra.mxu1 %vm123_vm0, %v1792_v57 }
  0x51   :  { %516 = vmatpush.msrb.mxu2 %v1860_v9  ;;  %476 = vmatpush.msrb.mxu1 %v1736_v35 }
  0x52   :  { %404 = vmatpush.msrb.mxu3 %v1874_v19  ;;  %582 = vmatpush.msra.mxu0 %v1687_v14 }
  0x53   :  { %517 = vmatpush.msrb.mxu2 %v1868_v17  ;;  %477 = vmatpush.msrb.mxu1 %v1744_v37 }
  0x54   :  { %405 = vmatpush.msrb.mxu3 %v1880_v23  ;;  %583 = vmatpush.msra.mxu0 %v1693_v16 }
  0x55   :  { %406 = vmatmul.f32.vlgmr.msrb.gmra.mxu3 %v1614_v49  ;;  %449 = vmatmul.f32.vlgmr.msrb.gmra.mxu0 %v1614_v49 }
  0x56   :  { %544 = vmatpush.msra.mxu3 %v1677_v11  ;;  %1287 = vmatmul.msk.f32.gmra.mxu2 %vm123_vm0, %v1792_v57 }
  0x57   :  { %518 = vmatpush.msrb.mxu2 %v1874_v19  ;;  %478 = vmatpush.msrb.mxu1 %v1750_v40 }
  0x58   :  { %545 = vmatpush.msra.mxu3 %v1683_v13  ;;  %1280 = vmatmul.msk.f32.gmra.mxu1 %vm123_vm0, %v1823_v63 }
  0x59   :  { %519 = vmatpush.msrb.mxu2 %v1880_v23  ;;  %479 = vmatpush.msrb.mxu1 %v1758_v43 }
  0x5a   :  { %546 = vmatpush.msra.mxu3 %v1689_v15  ;;  %584 = vmatpush.msra.mxu0 %v1706_v21 }
  0x5b   :  { %656 = vmatpush.msra.mxu2 %v1677_v11  ;;  %616 = vmatpush.msra.mxu1 %v1768_v46 }
  0x5c   :  { %547 = vmatpush.msra.mxu3 %v1697_v18  ;;  %585 = vmatpush.msra.mxu0 %v1714_v24 }
  0x5d   :  { %657 = vmatpush.msra.mxu2 %v1683_v13  ;;  %617 = vmatpush.msra.mxu1 %v1778_v50 }
  0x5e   :  { %548 = vmatpush.msra.mxu3 %v1708_v22  ;;  %1288 = vmatmul.msk.f32.gmra.mxu2 %vm123_vm0, %v1823_v63 }
  0x5f   :  { %658 = vmatpush.msra.mxu2 %v1689_v15  ;;  %618 = vmatpush.msra.mxu1 %v1783_v54 }
  0x60   :  { %549 = vmatpush.msra.mxu3 %v1716_v25  ;;  %586 = vmatpush.msra.mxu0 %v1722_v28 }
  0x61   :  { %659 = vmatpush.msra.mxu2 %v1697_v18  ;;  %619 = vmatpush.msra.mxu1 %v1790_v56 }
  0x62   :  { %550 = vmatpush.msra.mxu3 %v1724_v29  ;;  %1281 = vmatmul.msk.f32.gmra.mxu1 %vm123_vm0, %v1853_v8 }
  0x63   :  { %620 = vmatpush.msra.mxu1 %v1799_v58  ;;  %660 = vmatpush.msra.mxu2 %v1708_v22 }
  0x64   :  { %551 = vmatpush.msra.mxu3 %v1732_v33  ;;  %587 = vmatpush.msra.mxu0 %v1728_v31 }
  0x65   :  { %621 = vmatpush.msra.mxu1 %v1809_v60  ;;  %661 = vmatpush.msra.mxu2 %v1716_v25 }
  0x66   :  { %552 = vmatpush.msra.mxu3 %v1738_v36  ;;  %1289 = vmatmul.msk.f32.gmra.mxu2 %vm123_vm0, %v1853_v8 }
  0x67   :  { %622 = vmatpush.msra.mxu1 %v1815_v61  ;;  %588 = vmatpush.msra.mxu0 %v1736_v35 }
  0x68   :  { %553 = vmatpush.msra.mxu3 %v1746_v38  ;;  %662 = vmatpush.msra.mxu2 %v1724_v29 }
  0x69   :  { %623 = vmatpush.msra.mxu1 %v1821_v62  ;;  %589 = vmatpush.msra.mxu0 %v1744_v37 }
  0x6a   :  { %554 = vmatpush.msra.mxu3 %v1754_v41  ;;  %663 = vmatpush.msra.mxu2 %v1732_v33 }
  0x6b   :  { %624 = vmatpush.msra.mxu1 %v1830_v1  ;;  %590 = vmatpush.msra.mxu0 %v1750_v40 }
  0x6c   :  { %555 = vmatpush.msra.mxu3 %v1762_v45  ;;  %664 = vmatpush.msra.mxu2 %v1738_v36 }
  0x6d   :  { %625 = vmatpush.msra.mxu1 %v1838_v3  ;;  %591 = vmatpush.msra.mxu0 %v1758_v43 }
  0x6e   :  { %556 = vmatpush.msra.mxu3 %v1773_v48  ;;  %1290 = vmatmul.msk.f32.gmra.mxu2 %vm123_vm0, %v1704_v20 }
  0x6f   :  { %665 = vmatpush.msra.mxu2 %v1746_v38  ;;  %626 = vmatpush.msra.mxu1 %v1844_v5 }
  0x70   :  { %557 = vmatpush.msra.mxu3 %v1781_v53  ;;  %728 = vmatpush.msrb.mxu0 %v1768_v46 }
  0x71   :  { %666 = vmatpush.msra.mxu2 %v1754_v41  ;;  %627 = vmatpush.msra.mxu1 %v1850_v6 }
  0x72   :  { %558 = vmatpush.msra.mxu3 %v1788_v55  ;;  %729 = vmatpush.msrb.mxu0 %v1778_v50 }
  0x73   :  { %667 = vmatpush.msra.mxu2 %v1762_v45  ;;  %628 = vmatpush.msra.mxu1 %v1860_v9 }
  0x74   :  { %559 = vmatpush.msra.mxu3 %v1802_v59  ;;  %730 = vmatpush.msrb.mxu0 %v1783_v54 }
  0x75   :  { %668 = vmatpush.msra.mxu2 %v1773_v48  ;;  %629 = vmatpush.msra.mxu1 %v1868_v17 }
  0x76   :  { %688 = vmatpush.msrb.mxu3 %v1661_v0  ;;  %731 = vmatpush.msrb.mxu0 %v1790_v56 }
  0x77   :  { %669 = vmatpush.msra.mxu2 %v1781_v53  ;;  %630 = vmatpush.msra.mxu1 %v1874_v19 }
  0x78   :  { %689 = vmatpush.msrb.mxu3 %v1663_v2  ;;  %732 = vmatpush.msrb.mxu0 %v1799_v58 }
  0x79   :  { %670 = vmatpush.msra.mxu2 %v1788_v55  ;;  %631 = vmatpush.msra.mxu1 %v1880_v23 }
  0x7a   :  { %690 = vmatpush.msrb.mxu3 %v1666_v4  ;;  %733 = vmatpush.msrb.mxu0 %v1809_v60 }
  0x7b   :  { %671 = vmatpush.msra.mxu2 %v1802_v59 }
  0x7c   :  { %691 = vmatpush.msrb.mxu3 %v1669_v7  ;;  %734 = vmatpush.msrb.mxu0 %v1815_v61 }
  0x7e   :  { %692 = vmatpush.msrb.mxu3 %v1674_v10  ;;  %735 = vmatpush.msrb.mxu0 %v1821_v62 }
  0x80   :  { %693 = vmatpush.msrb.mxu3 %v1681_v12  ;;  %736 = vmatpush.msrb.mxu0 %v1830_v1 }
  0x82   :  { %694 = vmatpush.msrb.mxu3 %v1687_v14  ;;  %737 = vmatpush.msrb.mxu0 %v1838_v3 }
  0x84   :  { %695 = vmatpush.msrb.mxu3 %v1693_v16  ;;  %738 = vmatpush.msrb.mxu0 %v1844_v5 }
  0x86   :  { %696 = vmatpush.msrb.mxu3 %v1706_v21  ;;  %739 = vmatpush.msrb.mxu0 %v1850_v6 }
  0x88   :  { %697 = vmatpush.msrb.mxu3 %v1714_v24  ;;  %740 = vmatpush.msrb.mxu0 %v1860_v9 }
  0x8a   :  { %698 = vmatpush.msrb.mxu3 %v1722_v28  ;;  %741 = vmatpush.msrb.mxu0 %v1868_v17 }
  0x8c   :  { %699 = vmatpush.msrb.mxu3 %v1728_v31  ;;  %742 = vmatpush.msrb.mxu0 %v1874_v19 }
  0x8e   :  { %700 = vmatpush.msrb.mxu3 %v1736_v35  ;;  %743 = vmatpush.msrb.mxu0 %v1880_v23 }
  0x90   :  { %701 = vmatpush.msrb.mxu3 %v1744_v37 }
  0x92   :  { %702 = vmatpush.msrb.mxu3 %v1750_v40 }
  0x94   :  { %703 = vmatpush.msrb.mxu3 %v1758_v43 }
  0x9a   :  { %v165_v20 = vpop.f32.mrf.mxu0 }
  0x9b   :  { %v166_v51 = vadd.f32 %v165_v20, %v117_v27 }
  0xa2   :  { %v168_v30 = vpop.f32.mrf.mxu0  ;;  %v186_v34 = vpop.f32.mrf.mxu2 }
  0xa3   :  { %v2004_v32 = vadd.f32 %v168_v30, %v117_v27  ;;  %v2006_v39 = vadd.f32 %v186_v34, %v117_v27 }
  0xa5   :  { %2432 = vst [vmem:[#allocation27_spill] sm:$0xff] %v2004_v32 }
  0xa6   :  { %2433 = vst [vmem:[#allocation28_spill] sm:$0xff] %v2006_v39  ;;  %v206_v20 = vpop.f32.mrf.mxu1 }
  0xaa   :  { %v171_v42 = vpop.f32.mrf.mxu0 }
  0xab   :  { %v2008_v44 = vadd.f32 %v171_v42, %v117_v27 }
  0xad   :  { %2434 = vst [vmem:[#allocation29_spill] sm:$0xff] %v2008_v44 }
  0xb2   :  { %v174_v47 = vpop.f32.mrf.mxu0 }
  0xb3   :  { %v2010_v49 = vadd.f32 %v174_v47, %v117_v27  ;;  %v2018_v47 = vperm.slane %v115_v26, 1 }
  0xb5   :  { %2435 = vst [vmem:[#allocation30_spill] sm:$0xff] %v2010_v49 }
  0xb6   :  { %2439 = vst [vmem:[#allocation34_spill] sm:$0xff] %v2018_v47 }
  0xb8   :  { %v367_v52 = vpop.f32.mrf.mxu3 }
  0xb9   :  { %v370_v57 = vadd.f32 %v367_v52, %v166_v51  ;;  %v207_v51 = vadd.f32 %v206_v20, %v2018_v47 }
  0xba   :  { %v177_v63 = vpop.f32.mrf.mxu0 }
  0xbb   :  { %v1291_v8 = vmul.f32 -1.442695, %v370_v57  ;;  %v2012_v23 = vadd.f32 %v177_v63, %v117_v27 }
  0xbd   :  { %2436 = vst [vmem:[#allocation31_spill] sm:$0xff] %v2012_v23  ;;  %1347 = vpow2.f32 %v1291_v8 }
  0xc2   :  { %v180_v43 = vpop.f32.mrf.mxu0 }
  0xc3   :  { %v2014_v30 = vadd.f32 %v180_v43, %v117_v27  ;;  %v1348_v32 = vpop.eup %1347  ;;  %v2021_v43 = vpop.f32.mrf.mxu2 }
  0xc4   :  { %v374_v34 = vadd.f32 1.0, %v1348_v32  ;;  %2440 = vst [vmem:[#allocation35_spill] sm:$0xff] %v2021_v43 }
  0xc5   :  { %2437 = vst [vmem:[#allocation32_spill] sm:$0xff] %v2014_v30 }
  0xc6   :  { %1349 = vrcp.f32 %v374_v34  ;;  %v386_v30 = vand.u32 2147483648, %v374_v34  ;;  %vm380_vm2 = vweird.f32 %v374_v34 }
  0xca   :  { %v183_v39 = vpop.f32.mrf.mxu0 }
  0xcb   :  { %v2016_v42 = vadd.f32 %v183_v39, %v117_v27  ;;  %v384_v27 = vand.u32 2147483647, %v374_v34  ;;  %v2026_v39 = vld [vmem:[%s2400_s4] ss:$0 sm:$0xff] }
  0xcc   :  { %v1350_v44 = vpop.eup %1349 }
  0xcd   :  { %2438 = vst [vmem:[#allocation33_spill] sm:$0xff] %v2016_v42  ;;  %v376_v49 = vmul.f32 %v1350_v44, %v374_v34  ;;  %vm381_vm1 = vweird.f32 %v1350_v44  ;;  %vm385_vm4 = vcmp.eq.f32.partialorder %v384_v27, 8.507059e+37 }
  0xce   :  { %vm382_vm3 = vmor %vm380_vm2, %vm381_vm1 }
  0xcf   :  { %v377_v52 = vsub.f32 1.0, %v376_v49 }
  0xd1   :  { %v378_v23 = vmul.f32 %v1350_v44, %v377_v52 }
  0xd2   :  { %v450_v49 = vpop.f32.mrf.mxu0 }
  0xd3   :  { %v379_v32 = vadd.f32 %v1350_v44, %v378_v23  ;;  %v451_v52 = vadd.f32 %v2026_v39, %v450_v49 }
  0xd5   :  { %v383_v20 = vsel %vm382_vm3, %v1350_v44, %v379_v32 }
  0xd8   :  { %v407_v57 = vpop.f32.mrf.mxu3 }
  0xd9   :  { %v410_v63 = vadd.f32 %v407_v57, %v207_v51  ;;  %v387_v57 = vor.u32 1.1754944e-38, %v386_v30 }
  0xdb   :  { %v1292_v8 = vmul.f32 -1.442695, %v410_v63  ;;  %v2029_v63 = vperm.slane %v115_v26, 2  ;;  %v388_v23 = vsel %vm385_vm4, %v387_v57, %v383_v20 }
  0xdc   :  { %v453_v34 = vmul.f32 %v451_v52, %v388_v23  ;;  %v209_v23 = vpop.f32.mrf.mxu1 }
  0xdd   :  { %1351 = vpow2.f32 %v1292_v8  ;;  %v247_v8 = vpop.f32.mrf.mxu2 }
  0xde   :  { %v248_v43 = vadd.f32 %v247_v8, %v2029_v63 }
  0xe0   :  { %v454_v19 = vadd.f32 %v453_v34, %v248_v43  ;;  %v2447_v43 = vld [vmem:[#allocation26_spill] sm:$0xff] }
  0xe3   :  { %v1352_v42 = vpop.eup %1351 }
  0xe4   :  { %v414_v51 = vadd.f32 1.0, %v1352_v42  ;;  %v2088_v34 = vpop.f32.mrf.mxu1 }
  0xe5   :  { %2449 = vst [vmem:[#allocation37_spill] sm:$0xff] %v2088_v34  ;;  %v2459_v34 = vld [vmem:[#allocation27_spill] sm:$0xff] }
  0xe6   :  { %1353 = vrcp.f32 %v414_v51  ;;  %v426_v55 = vand.u32 2147483648, %v414_v51  ;;  %v424_v44 = vand.u32 2147483647, %v414_v51  ;;  %vm420_vm6 = vweird.f32 %v414_v51 }
  0xe7   :  { %1355 = vtanh.f32 %v454_v19  ;;  %v2445_v19 = vld [vmem:[#allocation22_spill] sm:$0xff] }
  0xe8   :  { %v427_v26 = vor.u32 1.1754944e-38, %v426_v55  ;;  %vm425_vm8 = vcmp.eq.f32.partialorder %v424_v44, 8.507059e+37  ;;  %v2442_v55 = vld [vmem:[#allocation21_spill] sm:$0xff] }
  0xec   :  { %v1354_v47 = vpop.eup %1353 }
  0xed   :  { %v416_v59 = vmul.f32 %v1354_v47, %v414_v51  ;;  %vm421_vm5 = vweird.f32 %v1354_v47  ;;  %v1356_v49 = vpop.eup %1355  ;;  %v250_v51 = vpop.f32.mrf.mxu2 }
  0xee   :  { %vm422_vm7 = vmor %vm420_vm6, %vm421_vm5 }
  0xef   :  { %v417_v40 = vsub.f32 1.0, %v416_v59  ;;  %v2443_v59 = vld [vmem:[#allocation18_spill] sm:$0xff] }
  0xf1   :  { %v418_v17 = vmul.f32 %v1354_v47, %v417_v40  ;;  %v2441_v40 = vld [vmem:[#allocation24_spill] sm:$0xff] }
  0xf3   :  { %v419_v30 = vadd.f32 %v1354_v47, %v418_v17  ;;  %v2444_v17 = vld [vmem:[#allocation25_spill] sm:$0xff] }
  0xf5   :  { %v423_v42 = vsel %vm422_vm7, %v1354_v47, %v419_v30  ;;  %v2446_v47 = vld [vmem:[#allocation19_spill] sm:$0xff]  ;;  %v2086_v8 = vpop.f32.mrf.mxu2  ;;  %v2092_v30 = vpop.f32.mrf.mxu1 }
  0xf6   :  { %v428_v32 = vsel %vm425_vm8, %v427_v26, %v423_v42  ;;  %2448 = vst [vmem:[#allocation36_spill] sm:$0xff] %v2086_v8 }
  0xf7   :  { %v456_v27 = vsub.f32 1.0, %v428_v32  ;;  %v458_v57 = vmul.f32 0.0, %v428_v32  ;;  %2451 = vst [vmem:[#allocation39_spill] sm:$0xff] %v2092_v30 }
  0xf9   :  { %v457_v20 = vmul.f32 %v1356_v49, %v456_v27 }
  0xfb   :  { %v2032_v52 = vadd.f32 %v458_v57, %v457_v20 }
  0xfd   :  { %460 = vst [vmem:[#allocation12] sm:$0xff] %v2032_v52  ;;  %480 = vmatmul.f32.vlgmr.msrb.gmra.mxu1 %v2032_v52  ;;  %520 = vmatmul.f32.vlgmr.msrb.gmra.mxu2 %v2032_v52  ;;  %v2090_v44 = vpop.f32.mrf.mxu2  ;;  %v2096_v42 = vpop.f32.mrf.mxu1 }
  0xfe   :  { %560 = vmatmul.f32.vlgmr.msra.gmra.mxu3 %v2032_v52  ;;  %768 = vmatpush.msrb.mxu1 %v1677_v11  ;;  %2450 = vst [vmem:[#allocation38_spill] sm:$0xff] %v2090_v44 }
  0xff   :  { %800 = vmatpush.msrb.mxu2 %v1661_v0  ;;  %840 = vmatpush.msra.mxu3 %v1768_v46  ;;  %2453 = vst [vmem:[#allocation41_spill] sm:$0xff] %v2096_v42 }
 0x100   :  { %769 = vmatpush.msrb.mxu1 %v1683_v13 }
 0x101   :  { %801 = vmatpush.msrb.mxu2 %v1663_v2  ;;  %841 = vmatpush.msra.mxu3 %v1778_v50 }
 0x102   :  { %770 = vmatpush.msrb.mxu1 %v1689_v15 }
 0x103   :  { %802 = vmatpush.msrb.mxu2 %v1666_v4  ;;  %842 = vmatpush.msra.mxu3 %v1783_v54 }
 0x104   :  { %771 = vmatpush.msrb.mxu1 %v1697_v18 }
 0x105   :  { %803 = vmatpush.msrb.mxu2 %v1669_v7  ;;  %843 = vmatpush.msra.mxu3 %v1790_v56  ;;  %v2094_v26 = vpop.f32.mrf.mxu2  ;;  %v2100_v27 = vpop.f32.mrf.mxu1 }
 0x106   :  { %772 = vmatpush.msrb.mxu1 %v1708_v22  ;;  %2452 = vst [vmem:[#allocation40_spill] sm:$0xff] %v2094_v26 }
 0x107   :  { %804 = vmatpush.msrb.mxu2 %v1674_v10  ;;  %844 = vmatpush.msra.mxu3 %v1799_v58  ;;  %2455 = vst [vmem:[#allocation43_spill] sm:$0xff] %v2100_v27 }
 0x108   :  { %773 = vmatpush.msrb.mxu1 %v1716_v25 }
 0x109   :  { %805 = vmatpush.msrb.mxu2 %v1681_v12  ;;  %845 = vmatpush.msra.mxu3 %v1809_v60 }
 0x10a   :  { %774 = vmatpush.msrb.mxu1 %v1724_v29 }
 0x10b   :  { %806 = vmatpush.msrb.mxu2 %v1687_v14  ;;  %846 = vmatpush.msra.mxu3 %v1815_v61 }
 0x10c   :  { %775 = vmatpush.msrb.mxu1 %v1732_v33 }
 0x10d   :  { %807 = vmatpush.msrb.mxu2 %v1693_v16  ;;  %847 = vmatpush.msra.mxu3 %v1821_v62  ;;  %v2098_v32 = vpop.f32.mrf.mxu2  ;;  %v2104_v20 = vpop.f32.mrf.mxu1 }
 0x10e   :  { %776 = vmatpush.msrb.mxu1 %v1738_v36  ;;  %2454 = vst [vmem:[#allocation42_spill] sm:$0xff] %v2098_v32 }
 0x10f   :  { %808 = vmatpush.msrb.mxu2 %v1706_v21  ;;  %848 = vmatpush.msra.mxu3 %v1830_v1  ;;  %2457 = vst [vmem:[#allocation45_spill] sm:$0xff] %v2104_v20 }
 0x110   :  { %777 = vmatpush.msrb.mxu1 %v1746_v38 }
 0x111   :  { %809 = vmatpush.msrb.mxu2 %v1714_v24  ;;  %849 = vmatpush.msra.mxu3 %v1838_v3 }
 0x112   :  { %778 = vmatpush.msrb.mxu1 %v1754_v41 }
 0x113   :  { %810 = vmatpush.msrb.mxu2 %v1722_v28  ;;  %850 = vmatpush.msra.mxu3 %v1844_v5 }
 0x114   :  { %779 = vmatpush.msrb.mxu1 %v1762_v45 }
 0x115   :  { %811 = vmatpush.msrb.mxu2 %v1728_v31  ;;  %851 = vmatpush.msra.mxu3 %v1850_v6  ;;  %v2102_v49 = vpop.f32.mrf.mxu2 }
 0x116   :  { %780 = vmatpush.msrb.mxu1 %v1773_v48  ;;  %2456 = vst [vmem:[#allocation44_spill] sm:$0xff] %v2102_v49 }
 0x117   :  { %812 = vmatpush.msrb.mxu2 %v1736_v35  ;;  %852 = vmatpush.msra.mxu3 %v1860_v9 }
 0x118   :  { %781 = vmatpush.msrb.mxu1 %v1781_v53 }
 0x119   :  { %813 = vmatpush.msrb.mxu2 %v1744_v37  ;;  %853 = vmatpush.msra.mxu3 %v2441_v40 }
 0x11a   :  { %782 = vmatpush.msrb.mxu1 %v2442_v55 }
 0x11b   :  { %814 = vmatpush.msrb.mxu2 %v2443_v59  ;;  %854 = vmatpush.msra.mxu3 %v2444_v17 }
 0x11c   :  { %783 = vmatpush.msrb.mxu1 %v2445_v19 }
 0x11d   :  { %815 = vmatpush.msrb.mxu2 %v2446_v47  ;;  %855 = vmatpush.msra.mxu3 %v2447_v43  ;;  %v2106_v57 = vpop.f32.mrf.mxu2  ;;  %v2460_v47 = vld [vmem:[#allocation34_spill] sm:$0xff] }
 0x11e   :  { %2458 = vst [vmem:[#allocation46_spill] sm:$0xff] %v2106_v57  ;;  %v210_v30 = vadd.f32 %v209_v23, %v2460_v47 }
 0x17a   :  { %v481_v8 = vpop.f32.mrf.mxu1 }
 0x17b   :  { %v484_v43 = vadd.f32 %v481_v8, %v2459_v34 }
 0x17d   :  { %v1293_v44 = vmul.f32 -1.442695, %v484_v43 }
 0x17f   :  { %1357 = vpow2.f32 %v1293_v44 }
 0x180   :  { %v521_v26 = vpop.f32.mrf.mxu2 }
 0x181   :  { %v524_v19 = vadd.f32 %v521_v26, %v210_v30  ;;  %v561_v23 = vpop.f32.mrf.mxu3 }
 0x182   :  { %v562_v26 = vadd.f32 %v2026_v39, %v561_v23 }
 0x183   :  { %v1294_v42 = vmul.f32 -1.442695, %v524_v19 }
 0x185   :  { %v1358_v17 = vpop.eup %1357  ;;  %1359 = vpow2.f32 %v1294_v42  ;;  %v251_v42 = vadd.f32 %v250_v51, %v2029_v63 }
 0x186   :  { %v488_v32 = vadd.f32 1.0, %v1358_v17 }
 0x188   :  { %1361 = vrcp.f32 %v488_v32  ;;  %v500_v55 = vand.u32 2147483648, %v488_v32  ;;  %v498_v43 = vand.u32 2147483647, %v488_v32  ;;  %vm494_vm10 = vweird.f32 %v488_v32 }
 0x18a   :  { %v501_v19 = vor.u32 1.1754944e-38, %v500_v55  ;;  %vm499_vm12 = vcmp.eq.f32.partialorder %v498_v43, 8.507059e+37 }
 0x18b   :  { %v1360_v27 = vpop.eup %1359 }
 0x18c   :  { %v528_v49 = vadd.f32 1.0, %v1360_v27 }
 0x18e   :  { %v1362_v59 = vpop.eup %1361  ;;  %1363 = vrcp.f32 %v528_v49  ;;  %v538_v37 = vand.u32 2147483647, %v528_v49  ;;  %vm534_vm14 = vweird.f32 %v528_v49 }
 0x18f   :  { %v490_v20 = vmul.f32 %v1362_v59, %v488_v32  ;;  %vm495_vm9 = vweird.f32 %v1362_v59 }
 0x190   :  { %vm496_vm11 = vmor %vm494_vm10, %vm495_vm9  ;;  %vm539_vm0 = vcmp.eq.f32.partialorder %v538_v37, 8.507059e+37 }
 0x191   :  { %v491_v57 = vsub.f32 1.0, %v490_v20 }
 0x193   :  { %v492_v40 = vmul.f32 %v1362_v59, %v491_v57  ;;  %v540_v57 = vand.u32 2147483648, %v528_v49 }
 0x194   :  { %v1364_v8 = vpop.eup %1363 }
 0x195   :  { %v530_v34 = vmul.f32 %v1364_v8, %v528_v49  ;;  %v493_v44 = vadd.f32 %v1362_v59, %v492_v40  ;;  %vm535_vm13 = vweird.f32 %v1364_v8  ;;  %v541_v40 = vor.u32 1.1754944e-38, %v540_v57  ;;  %v2474_v57 = vld [vmem:[#allocation36_spill] sm:$0xff] }
 0x196   :  { %vm536_vm15 = vmor %vm534_vm14, %vm535_vm13 }
 0x197   :  { %v531_v30 = vsub.f32 1.0, %v530_v34  ;;  %v497_v17 = vsel %vm496_vm11, %v1362_v59, %v493_v44 }
 0x198   :  { %v502_v27 = vsel %vm499_vm12, %v501_v19, %v497_v17 }
 0x199   :  { %v532_v20 = vmul.f32 %v1364_v8, %v531_v30  ;;  %v564_v47 = vmul.f32 %v562_v26, %v502_v27 }
 0x19b   :  { %v533_v53 = vadd.f32 %v1364_v8, %v532_v20  ;;  %v565_v9 = vadd.f32 %v564_v47, %v251_v42 }
 0x19d   :  { %v537_v32 = vsel %vm536_vm15, %v1364_v8, %v533_v53  ;;  %1365 = vtanh.f32 %v565_v9 }
 0x19e   :  { %v542_v55 = vsel %vm539_vm0, %v541_v40, %v537_v32  ;;  %v254_v40 = vadd.f32 %v2474_v57, %v2029_v63 }
 0x19f   :  { %v567_v59 = vsub.f32 1.0, %v542_v55  ;;  %v569_v51 = vmul.f32 %v542_v55, %v2032_v52 }
 0x1a3   :  { %v1366_v43 = vpop.eup %1365 }
 0x1a4   :  { %v568_v23 = vmul.f32 %v1366_v43, %v567_v59 }
 0x1a6   :  { %v2113_v34 = vadd.f32 %v569_v51, %v568_v23 }
 0x1a8   :  { %572 = vst [vmem:[#allocation12 + $0x8] sm:$0xff] %v2113_v34  ;;  %592 = vmatmul.f32.vlgmr.msra.gmra.mxu0 %v2113_v34  ;;  %632 = vmatmul.f32.vlgmr.msra.gmra.mxu1 %v2113_v34 }
 0x1a9   :  { %672 = vmatmul.f32.vlgmr.msra.gmra.mxu2 %v2113_v34  ;;  %880 = vmatpush.msra.mxu0 %v1677_v11  ;;  %v2466_v11 = vld [vmem:[#allocation18_spill] sm:$0xff] }
 0x1aa   :  { %912 = vmatpush.msra.mxu1 %v1661_v0  ;;  %952 = vmatpush.msra.mxu2 %v1768_v46  ;;  %v2461_v0 = vld [vmem:[#allocation23_spill] sm:$0xff] }
 0x1ab   :  { %881 = vmatpush.msra.mxu0 %v1683_v13  ;;  %v2468_v13 = vld [vmem:[#allocation22_spill] sm:$0xff] }
 0x1ac   :  { %913 = vmatpush.msra.mxu1 %v1663_v2  ;;  %953 = vmatpush.msra.mxu2 %v1778_v50  ;;  %v2462_v2 = vld [vmem:[#allocation20_spill] sm:$0xff] }
 0x1ad   :  { %882 = vmatpush.msra.mxu0 %v1689_v15  ;;  %v2470_v15 = vld [vmem:[#allocation26_spill] sm:$0xff] }
 0x1ae   :  { %914 = vmatpush.msra.mxu1 %v1666_v4  ;;  %954 = vmatpush.msra.mxu2 %v1783_v54  ;;  %v2463_v4 = vld [vmem:[#allocation17_spill] sm:$0xff] }
 0x1af   :  { %883 = vmatpush.msra.mxu0 %v1697_v18  ;;  %v2472_v18 = vld [vmem:[#allocation37_spill] sm:$0xff] }
 0x1b0   :  { %915 = vmatpush.msra.mxu1 %v1669_v7  ;;  %955 = vmatpush.msra.mxu2 %v1790_v56  ;;  %v2464_v7 = vld [vmem:[#allocation24_spill] sm:$0xff] }
 0x1b1   :  { %884 = vmatpush.msra.mxu0 %v1708_v22 }
 0x1b2   :  { %916 = vmatpush.msra.mxu1 %v1674_v10  ;;  %956 = vmatpush.msra.mxu2 %v1799_v58  ;;  %v2465_v10 = vld [vmem:[#allocation21_spill] sm:$0xff] }
 0x1b3   :  { %885 = vmatpush.msra.mxu0 %v1716_v25  ;;  %v2473_v25 = vld [vmem:[#allocation29_spill] sm:$0xff] }
 0x1b4   :  { %917 = vmatpush.msra.mxu1 %v1681_v12  ;;  %957 = vmatpush.msra.mxu2 %v1809_v60  ;;  %v2467_v12 = vld [vmem:[#allocation25_spill] sm:$0xff] }
 0x1b5   :  { %886 = vmatpush.msra.mxu0 %v1724_v29 }
 0x1b6   :  { %918 = vmatpush.msra.mxu1 %v1687_v14  ;;  %958 = vmatpush.msra.mxu2 %v1815_v61  ;;  %v2469_v14 = vld [vmem:[#allocation19_spill] sm:$0xff] }
 0x1b7   :  { %887 = vmatpush.msra.mxu0 %v1732_v33 }
 0x1b8   :  { %919 = vmatpush.msra.mxu1 %v1693_v16  ;;  %959 = vmatpush.msra.mxu2 %v1821_v62  ;;  %v2471_v16 = vld [vmem:[#allocation34_spill] sm:$0xff] }
 0x1b9   :  { %888 = vmatpush.msra.mxu0 %v1738_v36 }
 0x1ba   :  { %920 = vmatpush.msra.mxu1 %v1706_v21  ;;  %960 = vmatpush.msra.mxu2 %v1830_v1  ;;  %v213_v21 = vadd.f32 %v2472_v18, %v2471_v16  ;;  %v2180_v18 = vld [vmem:[#allocation9 + $0x178] sm:$0xff] }
 0x1bb   :  { %889 = vmatpush.msra.mxu0 %v1746_v38 }
 0x1bc   :  { %921 = vmatpush.msra.mxu1 %v1714_v24  ;;  %961 = vmatpush.msra.mxu2 %v1838_v3 }
 0x1bd   :  { %890 = vmatpush.msra.mxu0 %v1754_v41 }
 0x1be   :  { %922 = vmatpush.msra.mxu1 %v1722_v28  ;;  %962 = vmatpush.msra.mxu2 %v1844_v5 }
 0x1bf   :  { %891 = vmatpush.msra.mxu0 %v1762_v45 }
 0x1c0   :  { %923 = vmatpush.msra.mxu1 %v1728_v31  ;;  %963 = vmatpush.msra.mxu2 %v1850_v6 }
 0x1c1   :  { %892 = vmatpush.msra.mxu0 %v1773_v48 }
 0x1c2   :  { %924 = vmatpush.msra.mxu1 %v1736_v35  ;;  %964 = vmatpush.msra.mxu2 %v2461_v0 }
 0x1c3   :  { %893 = vmatpush.msra.mxu0 %v2462_v2 }
 0x1c4   :  { %925 = vmatpush.msra.mxu1 %v2463_v4  ;;  %965 = vmatpush.msra.mxu2 %v2464_v7 }
 0x1c5   :  { %894 = vmatpush.msra.mxu0 %v2465_v10 }
 0x1c6   :  { %926 = vmatpush.msra.mxu1 %v2466_v11  ;;  %966 = vmatpush.msra.mxu2 %v2467_v12 }
 0x1c7   :  { %895 = vmatpush.msra.mxu0 %v2468_v13 }
 0x1c8   :  { %927 = vmatpush.msra.mxu1 %v2469_v14  ;;  %967 = vmatpush.msra.mxu2 %v2470_v15 }
 0x225   :  { %v593_v22 = vpop.f32.mrf.mxu0  ;;  %v633_v24 = vpop.f32.mrf.mxu1 }
 0x226   :  { %v596_v28 = vadd.f32 %v593_v22, %v2473_v25  ;;  %v636_v29 = vadd.f32 %v633_v24, %v213_v21  ;;  %v2183_v21 = vld [vmem:[#allocation9 + $0x78] sm:$0xff]  ;;  %v2190_v22 = vld [vmem:[#allocation9 + $0x70] sm:$0xff]  ;;  %v2194_v24 = vld [vmem:[#allocation9 + $0x168] sm:$0xff] }
 0x227   :  { %v2197_v25 = vld [vmem:[#allocation9 + $0x68] sm:$0xff] }
 0x228   :  { %v1295_v31 = vmul.f32 -1.442695, %v596_v28  ;;  %v1296_v33 = vmul.f32 -1.442695, %v636_v29  ;;  %v2204_v28 = vld [vmem:[#allocation9 + $0x60] sm:$0xff]  ;;  %v2211_v29 = vld [vmem:[#allocation9 + $0x58] sm:$0xff] }
 0x22a   :  { %1367 = vpow2.f32 %v1295_v31  ;;  %v2218_v31 = vld [vmem:[#allocation9 + $0x50] sm:$0xff] }
 0x22b   :  { %1369 = vpow2.f32 %v1296_v33  ;;  %v2225_v33 = vld [vmem:[#allocation9 + $0x48] sm:$0xff] }
 0x22c   :  { %v673_v19 = vpop.f32.mrf.mxu2 }
 0x22d   :  { %v674_v42 = vadd.f32 %v2026_v39, %v673_v19  ;;  %v2476_v19 = vld [vmem:[#allocation30_spill] sm:$0xff] }
 0x230   :  { %v1368_v35 = vpop.eup %1367 }
 0x231   :  { %v1370_v36 = vpop.eup %1369  ;;  %v600_v37 = vadd.f32 1.0, %v1368_v35  ;;  %v2232_v35 = vld [vmem:[#allocation9 + $0x40] sm:$0xff] }
 0x232   :  { %v640_v38 = vadd.f32 1.0, %v1370_v36  ;;  %v2239_v36 = vld [vmem:[#allocation9 + $0x38] sm:$0xff] }
 0x233   :  { %1371 = vrcp.f32 %v600_v37  ;;  %v612_v47 = vand.u32 2147483648, %v600_v37  ;;  %v610_v8 = vand.u32 2147483647, %v600_v37  ;;  %vm606_vm2 = vweird.f32 %v600_v37 }
 0x234   :  { %1373 = vrcp.f32 %v640_v38  ;;  %v652_v32 = vand.u32 2147483648, %v640_v38  ;;  %vm646_vm6 = vweird.f32 %v640_v38  ;;  %v650_v59 = vand.u32 2147483647, %v640_v38 }
 0x235   :  { %v613_v17 = vor.u32 1.1754944e-38, %v612_v47  ;;  %vm611_vm4 = vcmp.eq.f32.partialorder %v610_v8, 8.507059e+37 }
 0x236   :  { %v653_v51 = vor.u32 1.1754944e-38, %v652_v32  ;;  %vm651_vm8 = vcmp.eq.f32.partialorder %v650_v59, 8.507059e+37 }
 0x239   :  { %v1372_v41 = vpop.eup %1371 }
 0x23a   :  { %v1374_v45 = vpop.eup %1373  ;;  %v602_v48 = vmul.f32 %v1372_v41, %v600_v37  ;;  %vm607_vm1 = vweird.f32 %v1372_v41  ;;  %v2246_v37 = vld [vmem:[#allocation9 + $0x30] sm:$0xff] }
 0x23b   :  { %v642_v53 = vmul.f32 %v1374_v45, %v640_v38  ;;  %vm608_vm3 = vmor %vm606_vm2, %vm607_vm1  ;;  %vm647_vm5 = vweird.f32 %v1374_v45  ;;  %v2253_v38 = vld [vmem:[#allocation9 + $0x28] sm:$0xff] }
 0x23c   :  { %v603_v9 = vsub.f32 1.0, %v602_v48  ;;  %vm648_vm7 = vmor %vm646_vm6, %vm647_vm5  ;;  %v2274_v48 = vld [vmem:[#allocation9 + $0x10] sm:$0xff] }
 0x23d   :  { %v643_v52 = vsub.f32 1.0, %v642_v53  ;;  %v2281_v53 = vld [vmem:[#allocation9 + $0x8] sm:$0xff] }
 0x23e   :  { %v604_v49 = vmul.f32 %v1372_v41, %v603_v9  ;;  %v2288_v9 = vld [vmem:[#allocation9] sm:$0xff] }
 0x23f   :  { %v644_v44 = vmul.f32 %v1374_v45, %v643_v52 }
 0x240   :  { %v605_v30 = vadd.f32 %v1372_v41, %v604_v49 }
 0x241   :  { %v645_v27 = vadd.f32 %v1374_v45, %v644_v44 }
 0x242   :  { %v609_v26 = vsel %vm608_vm3, %v1372_v41, %v605_v30  ;;  %v2260_v41 = vld [vmem:[#allocation9 + $0x20] sm:$0xff] }
 0x243   :  { %v614_v20 = vsel %vm611_vm4, %v613_v17, %v609_v26  ;;  %v649_v23 = vsel %vm648_vm7, %v1374_v45, %v645_v27  ;;  %v2267_v45 = vld [vmem:[#allocation9 + $0x18] sm:$0xff] }
 0x244   :  { %v676_v55 = vmul.f32 %v674_v42, %v614_v20  ;;  %v654_v2 = vsel %vm651_vm8, %v653_v51, %v649_v23 }
 0x245   :  { %v679_v4 = vsub.f32 1.0, %v654_v2  ;;  %v681_v13 = vmul.f32 %v654_v2, %v2113_v34  ;;  %v2187_v34 = vld [vmem:[#allocation9 + $0x170] sm:$0xff] }
 0x246   :  { %v677_v43 = vadd.f32 %v676_v55, %v254_v40 }
 0x248   :  { %1375 = vtanh.f32 %v677_v43 }
 0x24e   :  { %v1376_v10 = vpop.eup %1375 }
 0x24f   :  { %v680_v11 = vmul.f32 %v1376_v10, %v679_v4 }
 0x251   :  { %v2174_v14 = vadd.f32 %v681_v13, %v680_v11 }
 0x253   :  { %684 = vst [vmem:[#allocation12 + $0x10] sm:$0xff] %v2174_v14  ;;  %704 = vmatmul.f32.vlgmr.msrb.gmra.mxu3 %v2174_v14  ;;  %744 = vmatmul.f32.vlgmr.msrb.gmra.mxu0 %v2174_v14 }
 0x254   :  { %784 = vmatmul.f32.vlgmr.msrb.gmra.mxu1 %v2174_v14  ;;  %992 = vmatpush.msrb.mxu3 %v2180_v18 }
 0x255   :  { %1024 = vmatpush.msrb.mxu0 %v2183_v21  ;;  %1064 = vmatpush.msrb.mxu1 %v1768_v46  ;;  %v2201_v46 = vld [vmem:[#allocation9 + $0x160] sm:$0xff] }
 0x256   :  { %993 = vmatpush.msrb.mxu3 %v2187_v34 }
 0x257   :  { %1025 = vmatpush.msrb.mxu0 %v2190_v22  ;;  %1065 = vmatpush.msrb.mxu1 %v1778_v50  ;;  %v2208_v50 = vld [vmem:[#allocation9 + $0x158] sm:$0xff] }
 0x258   :  { %994 = vmatpush.msrb.mxu3 %v2194_v24 }
 0x259   :  { %1026 = vmatpush.msrb.mxu0 %v2197_v25  ;;  %1066 = vmatpush.msrb.mxu1 %v1783_v54  ;;  %v2215_v54 = vld [vmem:[#allocation9 + $0x150] sm:$0xff] }
 0x25a   :  { %995 = vmatpush.msrb.mxu3 %v2201_v46 }
 0x25b   :  { %1027 = vmatpush.msrb.mxu0 %v2204_v28  ;;  %1067 = vmatpush.msrb.mxu1 %v1790_v56  ;;  %v2222_v56 = vld [vmem:[#allocation9 + $0x148] sm:$0xff] }
 0x25c   :  { %996 = vmatpush.msrb.mxu3 %v2208_v50 }
 0x25d   :  { %1028 = vmatpush.msrb.mxu0 %v2211_v29  ;;  %1068 = vmatpush.msrb.mxu1 %v1799_v58  ;;  %v2229_v58 = vld [vmem:[#allocation9 + $0x140] sm:$0xff] }
 0x25e   :  { %997 = vmatpush.msrb.mxu3 %v2215_v54 }
 0x25f   :  { %1029 = vmatpush.msrb.mxu0 %v2218_v31  ;;  %1069 = vmatpush.msrb.mxu1 %v1809_v60  ;;  %v2236_v60 = vld [vmem:[#allocation9 + $0x138] sm:$0xff] }
 0x260   :  { %998 = vmatpush.msrb.mxu3 %v2222_v56 }
 0x261   :  { %1030 = vmatpush.msrb.mxu0 %v2225_v33  ;;  %1070 = vmatpush.msrb.mxu1 %v1815_v61  ;;  %v2243_v61 = vld [vmem:[#allocation9 + $0x130] sm:$0xff] }
 0x262   :  { %999 = vmatpush.msrb.mxu3 %v2229_v58 }
 0x263   :  { %1031 = vmatpush.msrb.mxu0 %v2232_v35  ;;  %1071 = vmatpush.msrb.mxu1 %v1821_v62  ;;  %v2250_v62 = vld [vmem:[#allocation9 + $0x128] sm:$0xff] }
 0x264   :  { %1000 = vmatpush.msrb.mxu3 %v2236_v60 }
 0x265   :  { %1032 = vmatpush.msrb.mxu0 %v2239_v36  ;;  %1072 = vmatpush.msrb.mxu1 %v1830_v1  ;;  %v2257_v1 = vld [vmem:[#allocation9 + $0x120] sm:$0xff] }
 0x266   :  { %1001 = vmatpush.msrb.mxu3 %v2243_v61 }
 0x267   :  { %1033 = vmatpush.msrb.mxu0 %v2246_v37  ;;  %1073 = vmatpush.msrb.mxu1 %v1838_v3  ;;  %v2264_v3 = vld [vmem:[#allocation9 + $0x118] sm:$0xff] }
 0x268   :  { %1002 = vmatpush.msrb.mxu3 %v2250_v62 }
 0x269   :  { %1034 = vmatpush.msrb.mxu0 %v2253_v38  ;;  %1074 = vmatpush.msrb.mxu1 %v1844_v5  ;;  %v2271_v5 = vld [vmem:[#allocation9 + $0x110] sm:$0xff] }
 0x26a   :  { %1003 = vmatpush.msrb.mxu3 %v2257_v1 }
 0x26b   :  { %1035 = vmatpush.msrb.mxu0 %v2260_v41  ;;  %1075 = vmatpush.msrb.mxu1 %v1850_v6  ;;  %v2278_v6 = vld [vmem:[#allocation9 + $0x108] sm:$0xff] }
 0x26c   :  { %1004 = vmatpush.msrb.mxu3 %v2264_v3 }
 0x26d   :  { %1036 = vmatpush.msrb.mxu0 %v2267_v45  ;;  %1076 = vmatpush.msrb.mxu1 %v2461_v0  ;;  %v2285_v0 = vld [vmem:[#allocation9 + $0x100] sm:$0xff] }
 0x26e   :  { %1005 = vmatpush.msrb.mxu3 %v2271_v5 }
 0x26f   :  { %1037 = vmatpush.msrb.mxu0 %v2274_v48  ;;  %1077 = vmatpush.msrb.mxu1 %v2464_v7  ;;  %v2475_v7 = vld [vmem:[#allocation39_spill] sm:$0xff] }
 0x270   :  { %1006 = vmatpush.msrb.mxu3 %v2278_v6  ;;  %v216_v52 = vadd.f32 %v2475_v7, %v2471_v16 }
 0x271   :  { %1038 = vmatpush.msrb.mxu0 %v2281_v53  ;;  %1078 = vmatpush.msrb.mxu1 %v2467_v12 }
 0x272   :  { %1007 = vmatpush.msrb.mxu3 %v2285_v0 }
 0x273   :  { %1039 = vmatpush.msrb.mxu0 %v2288_v9  ;;  %1079 = vmatpush.msrb.mxu1 %v2470_v15 }
 0x2d0   :  { %v745_v47 = vpop.f32.mrf.mxu0 }
 0x2d1   :  { %v748_v49 = vadd.f32 %v745_v47, %v216_v52  ;;  %v785_v2 = vpop.f32.mrf.mxu1  ;;  %v2477_v47 = vld [vmem:[#allocation38_spill] sm:$0xff] }
 0x2d2   :  { %v786_v11 = vadd.f32 %v2026_v39, %v785_v2 }
 0x2d3   :  { %v1298_v8 = vmul.f32 -1.442695, %v748_v49  ;;  %v257_v49 = vadd.f32 %v2477_v47, %v2029_v63 }
 0x2d5   :  { %1377 = vpow2.f32 %v1298_v8 }
 0x2d6   :  { %v705_v44 = vpop.f32.mrf.mxu3 }
 0x2d7   :  { %v708_v12 = vadd.f32 %v705_v44, %v2476_v19 }
 0x2d9   :  { %v1297_v30 = vmul.f32 -1.442695, %v708_v12 }
 0x2db   :  { %v1378_v17 = vpop.eup %1377  ;;  %1379 = vpow2.f32 %v1297_v30 }
 0x2dc   :  { %v752_v26 = vadd.f32 1.0, %v1378_v17 }
 0x2de   :  { %1381 = vrcp.f32 %v752_v26  ;;  %v764_v8 = vand.u32 2147483648, %v752_v26  ;;  %vm758_vm14 = vweird.f32 %v752_v26  ;;  %v762_v19 = vand.u32 2147483647, %v752_v26 }
 0x2e0   :  { %v765_v17 = vor.u32 1.1754944e-38, %v764_v8  ;;  %vm763_vm0 = vcmp.eq.f32.partialorder %v762_v19, 8.507059e+37 }
 0x2e1   :  { %v1380_v42 = vpop.eup %1379 }
 0x2e2   :  { %v712_v27 = vadd.f32 1.0, %v1380_v42 }
 0x2e4   :  { %1383 = vrcp.f32 %v712_v27  ;;  %v1382_v20 = vpop.eup %1381  ;;  %v724_v59 = vand.u32 2147483648, %v712_v27  ;;  %v722_v23 = vand.u32 2147483647, %v712_v27  ;;  %vm718_vm10 = vweird.f32 %v712_v27 }
 0x2e5   :  { %v754_v15 = vmul.f32 %v1382_v20, %v752_v26  ;;  %vm759_vm13 = vweird.f32 %v1382_v20  ;;  %v1459_v26 = vld [vmem:[#allocation9 + $0xf8] sm:$0xff] }
 0x2e6   :  { %v725_v10 = vor.u32 1.1754944e-38, %v724_v59  ;;  %vm723_vm12 = vcmp.eq.f32.partialorder %v722_v23, 8.507059e+37  ;;  %vm760_vm15 = vmor %vm758_vm14, %vm759_vm13 }
 0x2e7   :  { %v755_v32 = vsub.f32 1.0, %v754_v15 }
 0x2e9   :  { %v756_v51 = vmul.f32 %v1382_v20, %v755_v32 }
 0x2ea   :  { %v1384_v57 = vpop.eup %1383 }
 0x2eb   :  { %v714_v40 = vmul.f32 %v1384_v57, %v712_v27  ;;  %vm719_vm9 = vweird.f32 %v1384_v57  ;;  %v757_v7 = vadd.f32 %v1382_v20, %v756_v51 }
 0x2ec   :  { %vm720_vm11 = vmor %vm718_vm10, %vm719_vm9 }
 0x2ed   :  { %v715_v55 = vsub.f32 1.0, %v714_v40  ;;  %v761_v30 = vsel %vm760_vm15, %v1382_v20, %v757_v7  ;;  %v1461_v20 = vld [vmem:[#allocation9 + $0xe8] sm:$0xff] }
 0x2ee   :  { %v766_v42 = vsel %vm763_vm0, %v765_v17, %v761_v30 }
 0x2ef   :  { %v716_v43 = vmul.f32 %v1384_v57, %v715_v55  ;;  %v791_v27 = vsub.f32 1.0, %v766_v42  ;;  %v793_v40 = vmul.f32 %v766_v42, %v2174_v14  ;;  %v1460_v14 = vld [vmem:[#allocation9 + $0xf0] sm:$0xff]  ;;  %v1462_v55 = vld [vmem:[#allocation9 + $0xe0] sm:$0xff] }
 0x2f1   :  { %v717_v4 = vadd.f32 %v1384_v57, %v716_v43 }
 0x2f3   :  { %v721_v13 = vsel %vm720_vm11, %v1384_v57, %v717_v4 }
 0x2f4   :  { %v726_v52 = vsel %vm723_vm12, %v725_v10, %v721_v13 }
 0x2f5   :  { %v788_v44 = vmul.f32 %v786_v11, %v726_v52 }
 0x2f7   :  { %v789_v12 = vadd.f32 %v788_v44, %v257_v49 }
 0x2f9   :  { %1385 = vtanh.f32 %v789_v12 }
 0x2ff   :  { %v1386_v15 = vpop.eup %1385 }
 0x300   :  { %v792_v57 = vmul.f32 %v1386_v15, %v791_v27 }
 0x302   :  { %v2299_v32 = vadd.f32 %v793_v40, %v792_v57 }
 0x304   :  { %796 = vst [vmem:[#allocation12 + $0x18] sm:$0xff] %v2299_v32  ;;  %816 = vmatmul.f32.vlgmr.msrb.gmra.mxu2 %v2299_v32  ;;  %856 = vmatmul.f32.vlgmr.msra.gmra.mxu3 %v2299_v32 }
 0x305   :  { %896 = vmatmul.f32.vlgmr.msra.gmra.mxu0 %v2299_v32  ;;  %1104 = vmatpush.msrb.mxu2 %v2180_v18 }
 0x306   :  { %1136 = vmatpush.msra.mxu3 %v2183_v21  ;;  %1176 = vmatpush.msra.mxu0 %v1459_v26  ;;  %v1463_v21 = vld [vmem:[#allocation9 + $0xd8] sm:$0xff] }
 0x307   :  { %1105 = vmatpush.msrb.mxu2 %v2187_v34 }
 0x308   :  { %1137 = vmatpush.msra.mxu3 %v2190_v22  ;;  %1177 = vmatpush.msra.mxu0 %v1460_v14  ;;  %v1464_v22 = vld [vmem:[#allocation9 + $0xd0] sm:$0xff] }
 0x309   :  { %1106 = vmatpush.msrb.mxu2 %v2194_v24 }
 0x30a   :  { %1138 = vmatpush.msra.mxu3 %v2197_v25  ;;  %1178 = vmatpush.msra.mxu0 %v1461_v20  ;;  %v1465_v25 = vld [vmem:[#allocation9 + $0xc8] sm:$0xff]  ;;  %v2480_v20 = vld [vmem:[#allocation40_spill] sm:$0xff] }
 0x30b   :  { %1107 = vmatpush.msrb.mxu2 %v2201_v46 }
 0x30c   :  { %1139 = vmatpush.msra.mxu3 %v2204_v28  ;;  %1179 = vmatpush.msra.mxu0 %v1462_v55  ;;  %v1466_v28 = vld [vmem:[#allocation9 + $0xc0] sm:$0xff]  ;;  %v260_v55 = vadd.f32 %v2480_v20, %v2029_v63 }
 0x30d   :  { %1108 = vmatpush.msrb.mxu2 %v2208_v50 }
 0x30e   :  { %1140 = vmatpush.msra.mxu3 %v2211_v29  ;;  %1180 = vmatpush.msra.mxu0 %v1463_v21  ;;  %v1467_v29 = vld [vmem:[#allocation9 + $0xb8] sm:$0xff] }
 0x30f   :  { %1109 = vmatpush.msrb.mxu2 %v2215_v54 }
 0x310   :  { %1141 = vmatpush.msra.mxu3 %v2218_v31  ;;  %1181 = vmatpush.msra.mxu0 %v1464_v22  ;;  %v1468_v31 = vld [vmem:[#allocation9 + $0xb0] sm:$0xff] }
 0x311   :  { %1110 = vmatpush.msrb.mxu2 %v2222_v56 }
 0x312   :  { %1142 = vmatpush.msra.mxu3 %v2225_v33  ;;  %1182 = vmatpush.msra.mxu0 %v1465_v25  ;;  %v1469_v33 = vld [vmem:[#allocation9 + $0xa8] sm:$0xff] }
 0x313   :  { %1111 = vmatpush.msrb.mxu2 %v2229_v58 }
 0x314   :  { %1143 = vmatpush.msra.mxu3 %v2232_v35  ;;  %1183 = vmatpush.msra.mxu0 %v1466_v28  ;;  %v1470_v35 = vld [vmem:[#allocation9 + $0xa0] sm:$0xff] }
 0x315   :  { %1112 = vmatpush.msrb.mxu2 %v2236_v60 }
 0x316   :  { %1144 = vmatpush.msra.mxu3 %v2239_v36  ;;  %1184 = vmatpush.msra.mxu0 %v1467_v29  ;;  %v1471_v36 = vld [vmem:[#allocation9 + $0x98] sm:$0xff] }
 0x317   :  { %1113 = vmatpush.msrb.mxu2 %v2243_v61 }
 0x318   :  { %1145 = vmatpush.msra.mxu3 %v2246_v37  ;;  %1185 = vmatpush.msra.mxu0 %v1468_v31  ;;  %v1472_v37 = vld [vmem:[#allocation9 + $0x90] sm:$0xff] }
 0x319   :  { %1114 = vmatpush.msrb.mxu2 %v2250_v62 }
 0x31a   :  { %1146 = vmatpush.msra.mxu3 %v2253_v38  ;;  %1186 = vmatpush.msra.mxu0 %v1469_v33  ;;  %v1473_v38 = vld [vmem:[#allocation9 + $0x88] sm:$0xff] }
 0x31b   :  { %1115 = vmatpush.msrb.mxu2 %v2257_v1 }
 0x31c   :  { %1147 = vmatpush.msra.mxu3 %v2260_v41  ;;  %1187 = vmatpush.msra.mxu0 %v1470_v35  ;;  %v1474_v41 = vld [vmem:[#allocation9 + $0x80] sm:$0xff] }
 0x31d   :  { %1116 = vmatpush.msrb.mxu2 %v2264_v3 }
 0x31e   :  { %1148 = vmatpush.msra.mxu3 %v2267_v45  ;;  %1188 = vmatpush.msra.mxu0 %v1471_v36  ;;  %v2478_v45 = vld [vmem:[#allocation41_spill] sm:$0xff] }
 0x31f   :  { %1117 = vmatpush.msrb.mxu2 %v2271_v5  ;;  %v219_v59 = vadd.f32 %v2478_v45, %v2471_v16 }
 0x320   :  { %1149 = vmatpush.msra.mxu3 %v2274_v48  ;;  %1189 = vmatpush.msra.mxu0 %v1472_v37  ;;  %v2479_v48 = vld [vmem:[#allocation31_spill] sm:$0xff] }
 0x321   :  { %1118 = vmatpush.msrb.mxu2 %v2278_v6 }
 0x322   :  { %1150 = vmatpush.msra.mxu3 %v2281_v53  ;;  %1190 = vmatpush.msra.mxu0 %v1473_v38 }
 0x323   :  { %1119 = vmatpush.msrb.mxu2 %v2285_v0 }
 0x324   :  { %1151 = vmatpush.msra.mxu3 %v2288_v9  ;;  %1191 = vmatpush.msra.mxu0 %v1474_v41 }
 0x382   :  { %v897_v17 = vpop.f32.mrf.mxu0 }
 0x383   :  { %v898_v57 = vadd.f32 %v2026_v39, %v897_v17 }
 0x387   :  { %v817_v43 = vpop.f32.mrf.mxu2  ;;  %v857_v23 = vpop.f32.mrf.mxu3 }
 0x388   :  { %v820_v51 = vadd.f32 %v817_v43, %v2479_v48  ;;  %v860_v2 = vadd.f32 %v857_v23, %v219_v59 }
 0x38a   :  { %v1299_v4 = vmul.f32 -1.442695, %v820_v51  ;;  %v1300_v10 = vmul.f32 -1.442695, %v860_v2 }
 0x38c   :  { %1387 = vpow2.f32 %v1299_v4 }
 0x38d   :  { %1389 = vpow2.f32 %v1300_v10  ;;  %v2372_v10 = vld [vmem:[%s2400_s4] ss:$0 sm:$0xff]  ;;  %s1615_s4 = smov [#allocation12]  }
 0x38e   :  { %s1250_s19 = sshll.u32 %s1615_s4, 4  ;;  %s1251_s19 = int_to_ptr.vmem [resolvable:$true] %s1250_s19 }
 0x392   :  { %v1388_v53 = vpop.eup %1387 }
 0x393   :  { %v1390_v11 = vpop.eup %1389  ;;  %v824_v13 = vadd.f32 1.0, %v1388_v53 }
 0x394   :  { %v864_v7 = vadd.f32 1.0, %v1390_v11  ;;  %v2483_v11 = vld [vmem:[#allocation42_spill] sm:$0xff] }
 0x395   :  { %1391 = vrcp.f32 %v824_v13  ;;  %v836_v44 = vand.u32 2147483648, %v824_v13  ;;  %v834_v30 = vand.u32 2147483647, %v824_v13  ;;  %vm830_vm2 = vweird.f32 %v824_v13 }
 0x396   :  { %1393 = vrcp.f32 %v864_v7  ;;  %v876_v22 = vand.u32 2147483648, %v864_v7  ;;  %vm870_vm6 = vweird.f32 %v864_v7  ;;  %v874_v25 = vand.u32 2147483647, %v864_v7 }
 0x397   :  { %v837_v15 = vor.u32 1.1754944e-38, %v836_v44  ;;  %vm835_vm4 = vcmp.eq.f32.partialorder %v834_v30, 8.507059e+37 }
 0x398   :  { %v877_v31 = vor.u32 1.1754944e-38, %v876_v22  ;;  %vm875_vm8 = vcmp.eq.f32.partialorder %v874_v25, 8.507059e+37 }
 0x39b   :  { %v1392_v9 = vpop.eup %1391 }
 0x39c   :  { %v1394_v52 = vpop.eup %1393  ;;  %v826_v47 = vmul.f32 %v1392_v9, %v824_v13  ;;  %vm831_vm1 = vweird.f32 %v1392_v9  ;;  %v263_v13 = vadd.f32 %v2483_v11, %v2029_v63  ;;  %v2487_v11 = vld [vmem:[#allocation35_spill] sm:$0xff] }
 0x39d   :  { %v866_v49 = vmul.f32 %v1394_v52, %v864_v7  ;;  %vm832_vm3 = vmor %vm830_vm2, %vm831_vm1  ;;  %vm871_vm5 = vweird.f32 %v1394_v52 }
 0x39e   :  { %v827_v8 = vsub.f32 1.0, %v826_v47  ;;  %vm872_vm7 = vmor %vm870_vm6, %vm871_vm5 }
 0x39f   :  { %v867_v19 = vsub.f32 1.0, %v866_v49 }
 0x3a0   :  { %v828_v12 = vmul.f32 %v1392_v9, %v827_v8 }
 0x3a1   :  { %v868_v42 = vmul.f32 %v1394_v52, %v867_v19 }
 0x3a2   :  { %v829_v27 = vadd.f32 %v1392_v9, %v828_v12 }
 0x3a3   :  { %v869_v14 = vadd.f32 %v1394_v52, %v868_v42 }
 0x3a4   :  { %v833_v40 = vsel %vm832_vm3, %v1392_v9, %v829_v27 }
 0x3a5   :  { %v838_v26 = vsel %vm835_vm4, %v837_v15, %v833_v40  ;;  %v873_v29 = vsel %vm872_vm7, %v1394_v52, %v869_v14  ;;  %v2484_v40 = vld [vmem:[#allocation45_spill] sm:$0xff] }
 0x3a6   :  { %v900_v21 = vmul.f32 %v898_v57, %v838_v26  ;;  %v878_v33 = vsel %vm875_vm8, %v877_v31, %v873_v29  ;;  %v225_v26 = vadd.f32 %v2484_v40, %v2471_v16 }
 0x3a7   :  { %v903_v39 = vsub.f32 1.0, %v878_v33  ;;  %v905_v37 = vmul.f32 %v878_v33, %v2299_v32 }
 0x3a8   :  { %v901_v28 = vadd.f32 %v900_v21, %v260_v55  ;;  %v2485_v55 = vld [vmem:[#allocation33_spill] sm:$0xff] }
 0x3aa   :  { %1395 = vtanh.f32 %v901_v28 }
 0x3b0   :  { %v1396_v35 = vpop.eup %1395 }
 0x3b1   :  { %v904_v36 = vmul.f32 %v1396_v35, %v903_v39 }
 0x3b3   :  { %v2344_v38 = vadd.f32 %v905_v37, %v904_v36 }
 0x3b5   :  { %908 = vst [vmem:[#allocation12 + $0x20] sm:$0xff] %v2344_v38  ;;  %928 = vmatmul.f32.vlgmr.msra.gmra.mxu1 %v2344_v38  ;;  %968 = vmatmul.f32.vlgmr.msra.gmra.mxu2 %v2344_v38 }
 0x3b6   :  { %1008 = vmatmul.f32.vlgmr.msrb.gmra.mxu3 %v2344_v38  ;;  %1216 = vmatpush.msra.mxu1 %v2180_v18 }
 0x3b8   :  { %1217 = vmatpush.msra.mxu1 %v2187_v34  ;;  %v2481_v34 = vld [vmem:[#allocation32_spill] sm:$0xff] }
 0x3ba   :  { %1218 = vmatpush.msra.mxu1 %v2194_v24 }
 0x3bc   :  { %1219 = vmatpush.msra.mxu1 %v2201_v46 }
 0x3be   :  { %1220 = vmatpush.msra.mxu1 %v2208_v50  ;;  %v2482_v50 = vld [vmem:[#allocation43_spill] sm:$0xff] }
 0x3c0   :  { %1221 = vmatpush.msra.mxu1 %v2215_v54  ;;  %v222_v54 = vadd.f32 %v2482_v50, %v2471_v16 }
 0x3c2   :  { %1222 = vmatpush.msra.mxu1 %v2222_v56 }
 0x3c4   :  { %1223 = vmatpush.msra.mxu1 %v2229_v58 }
 0x3c6   :  { %1224 = vmatpush.msra.mxu1 %v2236_v60 }
 0x3c8   :  { %1225 = vmatpush.msra.mxu1 %v2243_v61 }
 0x3ca   :  { %1226 = vmatpush.msra.mxu1 %v2250_v62 }
 0x3cc   :  { %1227 = vmatpush.msra.mxu1 %v2257_v1 }
 0x3ce   :  { %1228 = vmatpush.msra.mxu1 %v2264_v3 }
 0x3d0   :  { %1229 = vmatpush.msra.mxu1 %v2271_v5 }
 0x3d2   :  { %1230 = vmatpush.msra.mxu1 %v2278_v6 }
 0x3d4   :  { %1231 = vmatpush.msra.mxu1 %v2285_v0 }
 0x432   :  { %v929_v18 = vpop.f32.mrf.mxu1 }
 0x433   :  { %v932_v24 = vadd.f32 %v929_v18, %v2481_v34 }
 0x435   :  { %v1301_v46 = vmul.f32 -1.442695, %v932_v24 }
 0x437   :  { %1397 = vpow2.f32 %v1301_v46 }
 0x438   :  { %v969_v56 = vpop.f32.mrf.mxu2 }
 0x439   :  { %v972_v58 = vadd.f32 %v969_v56, %v222_v54  ;;  %v1009_v43 = vpop.f32.mrf.mxu3 }
 0x43a   :  { %v1010_v53 = vadd.f32 %v2372_v10, %v1009_v43 }
 0x43b   :  { %v1302_v60 = vmul.f32 -1.442695, %v972_v58 }
 0x43d   :  { %v1398_v61 = vpop.eup %1397  ;;  %1399 = vpow2.f32 %v1302_v60 }
 0x43e   :  { %v936_v62 = vadd.f32 1.0, %v1398_v61 }
 0x440   :  { %1401 = vrcp.f32 %v936_v62  ;;  %v948_v32 = vand.u32 2147483648, %v936_v62  ;;  %v946_v45 = vand.u32 2147483647, %v936_v62  ;;  %vm942_vm10 = vweird.f32 %v936_v62 }
 0x442   :  { %v949_v51 = vor.u32 1.1754944e-38, %v948_v32  ;;  %vm947_vm12 = vcmp.eq.f32.partialorder %v946_v45, 8.507059e+37 }
 0x443   :  { %v1400_v1 = vpop.eup %1399 }
 0x444   :  { %v976_v3 = vadd.f32 1.0, %v1400_v1 }
 0x446   :  { %v1402_v5 = vpop.eup %1401  ;;  %1403 = vrcp.f32 %v976_v3  ;;  %v988_v52 = vand.u32 2147483648, %v976_v3  ;;  %v986_v49 = vand.u32 2147483647, %v976_v3  ;;  %vm982_vm14 = vweird.f32 %v976_v3 }
 0x447   :  { %v938_v6 = vmul.f32 %v1402_v5, %v936_v62  ;;  %vm943_vm9 = vweird.f32 %v1402_v5 }
 0x448   :  { %vm944_vm11 = vmor %vm942_vm10, %vm943_vm9  ;;  %v989_v19 = vor.u32 1.1754944e-38, %v988_v52  ;;  %vm987_vm0 = vcmp.eq.f32.partialorder %v986_v49, 8.507059e+37  ;;  %v2488_v49 = vld [vmem:[#allocation28_spill] sm:$0xff] }
 0x449   :  { %v939_v0 = vsub.f32 1.0, %v938_v6 }
 0x44b   :  { %v940_v41 = vmul.f32 %v1402_v5, %v939_v0 }
 0x44c   :  { %v1404_v59 = vpop.eup %1403 }
 0x44d   :  { %v978_v23 = vmul.f32 %v1404_v59, %v976_v3  ;;  %v941_v48 = vadd.f32 %v1402_v5, %v940_v41  ;;  %vm983_vm13 = vweird.f32 %v1404_v59 }
 0x44e   :  { %vm984_vm15 = vmor %vm982_vm14, %vm983_vm13 }
 0x44f   :  { %v979_v2 = vsub.f32 1.0, %v978_v23  ;;  %v945_v4 = vsel %vm944_vm11, %v1402_v5, %v941_v48  ;;  %v2486_v5 = vld [vmem:[#allocation44_spill] sm:$0xff] }
 0x450   :  { %v950_v7 = vsel %vm947_vm12, %v949_v51, %v945_v4  ;;  %v266_v6 = vadd.f32 %v2486_v5, %v2029_v63 }
 0x451   :  { %v980_v9 = vmul.f32 %v1404_v59, %v979_v2  ;;  %v1012_v47 = vmul.f32 %v1010_v53, %v950_v7 }
 0x453   :  { %v981_v8 = vadd.f32 %v1404_v59, %v980_v9  ;;  %v1013_v44 = vadd.f32 %v1012_v47, %v263_v13  ;;  %v228_v13 = vadd.f32 %v2487_v11, %v2471_v16 }
 0x455   :  { %v985_v12 = vsel %vm984_vm15, %v1404_v59, %v981_v8  ;;  %1405 = vtanh.f32 %v1013_v44 }
 0x456   :  { %v990_v30 = vsel %vm987_vm0, %v989_v19, %v985_v12 }
 0x457   :  { %v1015_v17 = vsub.f32 1.0, %v990_v30  ;;  %v1017_v15 = vmul.f32 %v990_v30, %v2344_v38 }
 0x45b   :  { %v1406_v42 = vpop.eup %1405 }
 0x45c   :  { %v1016_v27 = vmul.f32 %v1406_v42, %v1015_v17 }
 0x45e   :  { %v1018_v57 = vadd.f32 %v1017_v15, %v1016_v27 }
 0x460   :  { %1020 = vst [vmem:[#allocation12 + $0x28] sm:$0xff] %v1018_v57  ;;  %1040 = vmatmul.f32.vlgmr.msrb.gmra.mxu0 %v1018_v57  ;;  %1080 = vmatmul.f32.vlgmr.msrb.gmra.mxu1 %v1018_v57 }
 0x461   :  { %1120 = vmatmul.f32.vlgmr.msrb.gmra.mxu2 %v1018_v57 }
 0x4dd   :  { %v1041_v14 = vpop.f32.mrf.mxu0  ;;  %v1081_v20 = vpop.f32.mrf.mxu1 }
 0x4de   :  { %v1044_v21 = vadd.f32 %v1041_v14, %v2485_v55  ;;  %v1084_v22 = vadd.f32 %v1081_v20, %v225_v26 }
 0x4e0   :  { %v1303_v25 = vmul.f32 -1.442695, %v1044_v21  ;;  %v1304_v28 = vmul.f32 -1.442695, %v1084_v22 }
 0x4e2   :  { %1407 = vpow2.f32 %v1303_v25 }
 0x4e3   :  { %1409 = vpow2.f32 %v1304_v28 }
 0x4e4   :  { %v1121_v56 = vpop.f32.mrf.mxu2 }
 0x4e5   :  { %v1122_v62 = vadd.f32 %v2372_v10, %v1121_v56 }
 0x4e8   :  { %v1408_v29 = vpop.eup %1407 }
 0x4e9   :  { %v1410_v31 = vpop.eup %1409  ;;  %v1048_v33 = vadd.f32 1.0, %v1408_v29 }
 0x4ea   :  { %v1088_v39 = vadd.f32 1.0, %v1410_v31 }
 0x4eb   :  { %1411 = vrcp.f32 %v1048_v33  ;;  %v1060_v24 = vand.u32 2147483648, %v1048_v33  ;;  %v1058_v50 = vand.u32 2147483647, %v1048_v33  ;;  %vm1054_vm2 = vweird.f32 %v1048_v33 }
 0x4ec   :  { %1413 = vrcp.f32 %v1088_v39  ;;  %v1100_v0 = vand.u32 2147483648, %v1088_v39  ;;  %vm1094_vm6 = vweird.f32 %v1088_v39  ;;  %v1098_v41 = vand.u32 2147483647, %v1088_v39 }
 0x4ed   :  { %v1061_v60 = vor.u32 1.1754944e-38, %v1060_v24  ;;  %vm1059_vm4 = vcmp.eq.f32.partialorder %v1058_v50, 8.507059e+37 }
 0x4ee   :  { %v1101_v43 = vor.u32 1.1754944e-38, %v1100_v0  ;;  %vm1099_vm8 = vcmp.eq.f32.partialorder %v1098_v41, 8.507059e+37 }
 0x4f1   :  { %v1412_v35 = vpop.eup %1411 }
 0x4f2   :  { %v1414_v36 = vpop.eup %1413  ;;  %v1050_v37 = vmul.f32 %v1412_v35, %v1048_v33  ;;  %vm1055_vm1 = vweird.f32 %v1412_v35 }
 0x4f3   :  { %v1090_v38 = vmul.f32 %v1414_v36, %v1088_v39  ;;  %vm1056_vm3 = vmor %vm1054_vm2, %vm1055_vm1  ;;  %vm1095_vm5 = vweird.f32 %v1414_v36  ;;  %v2489_v39 = vld [vmem:[#allocation46_spill] sm:$0xff] }
 0x4f4   :  { %v1051_v18 = vsub.f32 1.0, %v1050_v37  ;;  %vm1096_vm7 = vmor %vm1094_vm6, %vm1095_vm5 }
 0x4f5   :  { %v1091_v34 = vsub.f32 1.0, %v1090_v38 }
 0x4f6   :  { %v1052_v46 = vmul.f32 %v1412_v35, %v1051_v18 }
 0x4f7   :  { %v1092_v54 = vmul.f32 %v1414_v36, %v1091_v34 }
 0x4f8   :  { %v1053_v58 = vadd.f32 %v1412_v35, %v1052_v46 }
 0x4f9   :  { %v1093_v1 = vadd.f32 %v1414_v36, %v1092_v54 }
 0x4fa   :  { %v1057_v61 = vsel %vm1056_vm3, %v1412_v35, %v1053_v58  ;;  %v269_v35 = vadd.f32 %v2489_v39, %v2029_v63 }
 0x4fb   :  { %v1062_v3 = vsel %vm1059_vm4, %v1061_v60, %v1057_v61  ;;  %v1097_v59 = vsel %vm1096_vm7, %v1414_v36, %v1093_v1 }
 0x4fc   :  { %v1124_v32 = vmul.f32 %v1122_v62, %v1062_v3  ;;  %v1102_v23 = vsel %vm1099_vm8, %v1101_v43, %v1097_v59 }
 0x4fd   :  { %v1127_v48 = vsub.f32 1.0, %v1102_v23  ;;  %v1129_v4 = vmul.f32 %v1102_v23, %v1018_v57 }
 0x4fe   :  { %v1125_v45 = vadd.f32 %v1124_v32, %v266_v6 }
 0x500   :  { %1415 = vtanh.f32 %v1125_v45 }
 0x506   :  { %v1416_v51 = vpop.eup %1415 }
 0x507   :  { %v1128_v2 = vmul.f32 %v1416_v51, %v1127_v48 }
 0x509   :  { %v1130_v53 = vadd.f32 %v1129_v4, %v1128_v2 }
 0x50b   :  { %1132 = vst [vmem:[#allocation12 + $0x30] sm:$0xff] %v1130_v53  ;;  %1152 = vmatmul.f32.vlgmr.msra.gmra.mxu3 %v1130_v53  ;;  %1192 = vmatmul.f32.vlgmr.msra.gmra.mxu0 %v1130_v53 }
 0x50c   :  { %1232 = vmatmul.f32.vlgmr.msra.gmra.mxu1 %v1130_v53 }
 0x588   :  { %v1193_v7 = vpop.f32.mrf.mxu0 }
 0x589   :  { %v1196_v9 = vadd.f32 %v1193_v7, %v228_v13  ;;  %v1233_v21 = vpop.f32.mrf.mxu1 }
 0x58a   :  { %v1234_v28 = vadd.f32 %v2372_v10, %v1233_v21 }
 0x58b   :  { %v1306_v52 = vmul.f32 -1.442695, %v1196_v9 }
 0x58d   :  { %1417 = vpow2.f32 %v1306_v52 }
 0x58e   :  { %v1153_v47 = vpop.f32.mrf.mxu3 }
 0x58f   :  { %v1156_v8 = vadd.f32 %v1153_v47, %v2488_v49 }
 0x591   :  { %v1305_v44 = vmul.f32 -1.442695, %v1156_v8 }
 0x593   :  { %v1418_v19 = vpop.eup %1417  ;;  %1419 = vpow2.f32 %v1305_v44 }
 0x594   :  { %v1200_v12 = vadd.f32 1.0, %v1418_v19 }
 0x596   :  { %1421 = vrcp.f32 %v1200_v12  ;;  %v1212_v36 = vand.u32 2147483648, %v1200_v12  ;;  %vm1206_vm14 = vweird.f32 %v1200_v12  ;;  %v1210_v38 = vand.u32 2147483647, %v1200_v12 }
 0x598   :  { %v1213_v24 = vor.u32 1.1754944e-38, %v1212_v36  ;;  %vm1211_vm0 = vcmp.eq.f32.partialorder %v1210_v38, 8.507059e+37 }
 0x599   :  { %v1420_v30 = vpop.eup %1419 }
 0x59a   :  { %v1160_v17 = vadd.f32 1.0, %v1420_v30 }
 0x59c   :  { %1423 = vrcp.f32 %v1160_v17  ;;  %v1422_v42 = vpop.eup %1421  ;;  %v1172_v26 = vand.u32 2147483648, %v1160_v17  ;;  %v1170_v20 = vand.u32 2147483647, %v1160_v17  ;;  %vm1166_vm10 = vweird.f32 %v1160_v17 }
 0x59d   :  { %v1202_v27 = vmul.f32 %v1422_v42, %v1200_v12  ;;  %vm1207_vm13 = vweird.f32 %v1422_v42 }
 0x59e   :  { %v1173_v25 = vor.u32 1.1754944e-38, %v1172_v26  ;;  %vm1171_vm12 = vcmp.eq.f32.partialorder %v1170_v20, 8.507059e+37  ;;  %vm1208_vm15 = vmor %vm1206_vm14, %vm1207_vm13 }
 0x59f   :  { %v1203_v16 = vsub.f32 1.0, %v1202_v27 }
 0x5a1   :  { %v1204_v55 = vmul.f32 %v1422_v42, %v1203_v16 }
 0x5a2   :  { %v1424_v15 = vpop.eup %1423 }
 0x5a3   :  { %v1162_v57 = vmul.f32 %v1424_v15, %v1160_v17  ;;  %vm1167_vm9 = vweird.f32 %v1424_v15  ;;  %v1205_v31 = vadd.f32 %v1422_v42, %v1204_v55 }
 0x5a4   :  { %vm1168_vm11 = vmor %vm1166_vm10, %vm1167_vm9 }
 0x5a5   :  { %v1163_v40 = vsub.f32 1.0, %v1162_v57  ;;  %v1209_v34 = vsel %vm1208_vm15, %v1422_v42, %v1205_v31 }
 0x5a6   :  { %v1214_v46 = vsel %vm1211_vm0, %v1213_v24, %v1209_v34 }
 0x5a7   :  { %v1164_v14 = vmul.f32 %v1424_v15, %v1163_v40  ;;  %v1239_v10 = vsub.f32 1.0, %v1214_v46  ;;  %v1241_v63 = vmul.f32 %v1214_v46, %v1130_v53 }
 0x5a9   :  { %v1165_v22 = vadd.f32 %v1424_v15, %v1164_v14 }
 0x5ab   :  { %v1169_v29 = vsel %vm1168_vm11, %v1424_v15, %v1165_v22 }
 0x5ac   :  { %v1174_v33 = vsel %vm1171_vm12, %v1173_v25, %v1169_v29 }
 0x5ad   :  { %v1236_v37 = vmul.f32 %v1234_v28, %v1174_v33 }
 0x5af   :  { %v1237_v18 = vadd.f32 %v1236_v37, %v269_v35 }
 0x5b1   :  { %1425 = vtanh.f32 %v1237_v18 }
 0x5b7   :  { %v1426_v50 = vpop.eup %1425 }
 0x5b8   :  { %v1240_v54 = vmul.f32 %v1426_v50, %v1239_v10 }
 0x5ba   :  { %v1242_v56 = vadd.f32 %v1241_v63, %v1240_v54 }
 0x5bc   :  { %1244 = vst [vmem:[#allocation12 + $0x38] sm:$0xff] %v1242_v56 }
 0x5bd   :  { %1258 = dma.vmem_to_hbm [thread:$0]  %s1251_s19, 1024, %s1253_s22, [#allocation6], %s1611_s13, %s1611_s13, %s1612_s14  }
 0x5be   :  { %1602 = dma.done.wait [#allocation6], 1024  }
 0x5bf   :  { %1603 = vsyncadd [#allocation6], 4294966272 }
 0x5c0   :  { %1263 = vsyncpa [#allocation5], 1 }
 0x5c1   :  { %1264 = vsyncpa [#allocation8], 1 }
 0x5c2   :  { %1265 = vsyncpa [#allocation11], 1 }
 0x5c3   :  { %1266 = vsyncpa [#allocation6], 1 }

</bundles_post_ra>
